<compile_context>
chip_gen: v7x
topology: tpu7x:2x2x1
jax: 0.10.0
libtpu: 0.0.40
codegen_flags: <defaults>
</compile_context>

<pallas_src>
import jax
import jax.numpy as jnp
from jax.experimental import pallas as pl
from jax.experimental.pallas import tpu as pltpu


def _round_up(v, m):
    return (v + m - 1) // m * m


def _tconv_kernel(w_ref, shift_ref, x_ref, o_ref):
    """Fused temporal conv + folded-BN shift + ReLU. NCHW layout, VPU compute.

    w_ref:     SMEM (C_out*C_in*K,) f32   BN-scale-folded conv weights
    shift_ref: SMEM (C_out,)        f32   folded BN shift (incl. conv bias)
    x_ref:     VMEM (1, C_in, th, W)      input tile  (W on lanes)
    o_ref:     VMEM (1, C_out, th, W_out) output tile (W_out on lanes)
    """
    _, c_in, _, w = x_ref.shape
    _, c_out, _, w_out = o_ref.shape
    k_size = w - w_out + 1

    # K lane-shifted windows per input channel, extracted once and reused for
    # every output channel.  Each is a static lane-window slice (XLU), replacing
    # the old per-tap sublane slice + (tm*W_out, C_in) relayout + MXU dot.
    taps = []
    for ci in range(c_in):
        xc = x_ref[0, ci, :, :].astype(jnp.float32)          # (th, W)
        for k in range(k_size):
            taps.append(xc[:, k:k + w_out])                  # (th, W_out)

    # Per output channel: C_in*K scalar-broadcast FMAs (weights already carry the
    # BN scale), then shift + ReLU, and a single store.  Everything stays f32
    # until the final cast (v5e has no bf16 VPU/EUP).
    for co in range(c_out):
        base = co * c_in * k_size
        acc = taps[0] * w_ref[base]
        for t in range(1, c_in * k_size):
            acc = acc + taps[t] * w_ref[base + t]
        o_ref[0, co, :, :] = jnp.maximum(acc + shift_ref[co], 0.0).astype(o_ref.dtype)


def temporal_convolution(x_nchw, conv_w, conv_b, bn_gamma, bn_beta, bn_mean,
                         bn_var, *, eps=1e-5, th=None, use_bf16_inputs=False,
                         vmem_limit_bytes=None):
    """x_nchw: [N, C_in, H, W]; conv_w: [C_out, C_in, 1, K]; conv_b: [C_out]."""
    n, c_in, h, w = x_nchw.shape
    c_out, c_in_w, k_h, k = conv_w.shape
    assert c_in_w == c_in and k_h == 1 and w >= k
    w_out = w - k + 1
    out_dtype = x_nchw.dtype

    # ---- generation-aware VMEM sizing (v5e/v6e: 128 MiB, v7x: 64 MiB) ----
    try:
        vmem_cap = int(pltpu.get_tpu_info().vmem_capacity_bytes)
    except Exception:
        vmem_cap = 64 * 1024 * 1024            # conservative (v7x-safe) fallback
    if vmem_limit_bytes is None:
        vmem_limit_bytes = int(min(vmem_cap * 3 // 4, vmem_cap - (8 << 20)))
    budget = max(8 << 20, int(vmem_cap * 0.4))

    x = x_nchw.astype(jnp.bfloat16) if use_bf16_inputs else x_nchw
    x_itemsize = x.dtype.itemsize
    out_itemsize = jnp.dtype(out_dtype).itemsize

    # Per-H-row VMEM bytes: double-buffered input/output tiles (last dim lane-
    # padded to 128) plus an allowance for the in-kernel f32 tap/acc temporaries.
    row_bytes = (2 * c_in * _round_up(w, 128) * x_itemsize
                 + 2 * c_out * _round_up(w_out, 128) * out_itemsize
                 + (c_in * k + 2) * _round_up(w_out, 128) * 4)

    if th is None:
        th = (budget // row_bytes) // 8 * 8
        th = max(8, min(th, 1024))
        if n == 1 and h >= 16:
            # Keep >= 2 grid steps so both v7x TensorCores get work.
            th = min(th, max(8, _round_up(pl.cdiv(h, 2), 8)))
    if th >= h:
        th = h                      # full-H block: always a legal block shape
    else:
        th = max(8, th // 8 * 8)    # multiple of 8; remainder tiles are masked
    grid = (n, pl.cdiv(h, th))

    # ---- fold conv bias + eval-mode BN into per-channel weights / shift ----
    scale = (bn_gamma / jnp.sqrt(bn_var + eps)).astype(jnp.float32)       # [C_out]
    w_folded = (conv_w[:, :, 0, :].astype(jnp.float32)
                * scale[:, None, None])                                   # [C_out,C_in,K]
    w_flat = w_folded.reshape(-1)                                         # [C_out*C_in*K]
    shift = (bn_beta + scale * (conv_b - bn_mean)).astype(jnp.float32)    # [C_out]

    cost = pl.CostEstimate(
        flops=2 * n * h * w_out * k * c_in * c_out,
        transcendentals=0,
        bytes_accessed=(x.size * x_itemsize
                        + int(w_flat.size) * 4 + int(shift.size) * 4
                        + n * c_out * h * w_out * out_itemsize))

    out = pl.pallas_call(
        _tconv_kernel,
        out_shape=jax.ShapeDtypeStruct((n, c_out, h, w_out), out_dtype),
        grid=grid,
        in_specs=[
            pl.BlockSpec(memory_space=pltpu.MemorySpace.SMEM),   # folded weights
            pl.BlockSpec(memory_space=pltpu.MemorySpace.SMEM),   # folded shift
            pl.BlockSpec((1, c_in, th, w), lambda ni, hi: (ni, 0, hi, 0)),
        ],
        out_specs=pl.BlockSpec((1, c_out, th, w_out), lambda ni, hi: (ni, 0, hi, 0)),
        compiler_params=pltpu.CompilerParams(
            dimension_semantics=("parallel", "parallel"),
            vmem_limit_bytes=vmem_limit_bytes),
        cost_estimate=cost,
    )(w_flat, shift, x)
    return out


def _reference(x_nchw, conv_w, conv_b, bn_gamma, bn_beta, bn_mean, bn_var, eps=1e-5):
    """Pure-JAX reference (eval-mode BN) for correctness checking."""
    y = jax.lax.conv_general_dilated(
        x_nchw, conv_w, window_strides=(1, 1), padding="VALID",
        dimension_numbers=("NCHW", "OIHW", "NCHW"))
    y = y + conv_b[None, :, None, None]
    scale = bn_gamma / jnp.sqrt(bn_var + eps)
    y = (y - bn_mean[None, :, None, None]) * scale[None, :, None, None] \
        + bn_beta[None, :, None, None]
    return jnp.maximum(y, 0.0)


if __name__ == "__main__":
    key = jax.random.PRNGKey(0)
    k_x, k_w, k_b, k_g, k_bt, k_m, k_v = jax.random.split(key, 7)

    N, C_IN, H, W = 2, 4, 16, 16
    C_OUT, K = 8, 3

    x = jax.random.normal(k_x, (N, C_IN, H, W), dtype=jnp.float32)
    conv_w = jax.random.normal(k_w, (C_OUT, C_IN, 1, K), dtype=jnp.float32) * 0.1
    conv_b = jax.random.normal(k_b, (C_OUT,), dtype=jnp.float32) * 0.1
    bn_gamma = 1.0 + 0.1 * jax.random.normal(k_g, (C_OUT,), dtype=jnp.float32)
    bn_beta = 0.1 * jax.random.normal(k_bt, (C_OUT,), dtype=jnp.float32)
    bn_mean = 0.1 * jax.random.normal(k_m, (C_OUT,), dtype=jnp.float32)
    bn_var = jnp.abs(jax.random.normal(k_v, (C_OUT,), dtype=jnp.float32)) + 0.5

    out = temporal_convolution(x, conv_w, conv_b, bn_gamma, bn_beta, bn_mean, bn_var)
    out = jax.block_until_ready(out)

    ref = _reference(x, conv_w, conv_b, bn_gamma, bn_beta, bn_mean, bn_var)
    assert out.shape == (N, C_OUT, H, W - K + 1), out.shape
    assert jnp.allclose(out, ref, atol=1e-4, rtol=1e-4), \
        float(jnp.max(jnp.abs(out - ref)))

    # Second case: N=1, H not a multiple of 8 -> full-H block path.
    x2 = jax.random.normal(k_x, (1, C_IN, 5, W), dtype=jnp.float32)
    out2 = jax.block_until_ready(
        temporal_convolution(x2, conv_w, conv_b, bn_gamma, bn_beta, bn_mean, bn_var))
    ref2 = _reference(x2, conv_w, conv_b, bn_gamma, bn_beta, bn_mean, bn_var)
    assert out2.shape == (1, C_OUT, 5, W - K + 1), out2.shape
    assert jnp.allclose(out2, ref2, atol=1e-4, rtol=1e-4), \
        float(jnp.max(jnp.abs(out2 - ref2)))

    print("KERNEL_OK")
</pallas_src>

<mosaic_0001>
module attributes {stable_mosaic.version = 11 : i64} {
  func.func @_tconv_kernel(%arg0: i32, %arg1: i32, %arg2: memref<96xf32, #tpu.memory_space<smem>>, %arg3: memref<8xf32, #tpu.memory_space<smem>>, %arg4: memref<1x4x16x16xf32, #tpu.memory_space<vmem>>, %arg5: memref<1x8x16x14xf32, #tpu.memory_space<vmem>>) attributes {dimension_semantics = [#tpu.dimension_semantics<parallel>, #tpu.dimension_semantics<parallel>], iteration_bounds = array<i64: 2, 1>, scalar_prefetch = 0 : i64, scratch_operands = 0 : i64, tpu.core_type = #tpu.core_type<tc>, window_params = [{transform_indices = @transform_0, window_bounds = array<i64: 96>}, {transform_indices = @transform_1, window_bounds = array<i64: 8>}, {transform_indices = @transform_2, window_bounds = array<i64: 1, 4, 16, 16>}, {transform_indices = @transform_3, window_bounds = array<i64: 1, 8, 16, 14>}]} {
    %c0 = arith.constant 0 : index
    %c0_0 = arith.constant 0 : index
    %c0_1 = arith.constant 0 : index
    %c0_2 = arith.constant 0 : index
    %0 = vector.load %arg4[%c0, %c0_0, %c0_1, %c0_2] : memref<1x4x16x16xf32, #tpu.memory_space<vmem>>, vector<1x1x16x16xf32>
    %1 = vector.shape_cast %0 : vector<1x1x16x16xf32> to vector<16x16xf32>
    %2 = vector.extract_strided_slice %1 {offsets = [0, 0], sizes = [16, 14], strides = [1, 1]} : vector<16x16xf32> to vector<16x14xf32>
    %3 = vector.extract_strided_slice %1 {offsets = [0, 1], sizes = [16, 14], strides = [1, 1]} : vector<16x16xf32> to vector<16x14xf32>
    %4 = vector.extract_strided_slice %1 {offsets = [0, 2], sizes = [16, 14], strides = [1, 1]} : vector<16x16xf32> to vector<16x14xf32>
    %c0_3 = arith.constant 0 : index
    %c1 = arith.constant 1 : index
    %c0_4 = arith.constant 0 : index
    %c0_5 = arith.constant 0 : index
    %5 = vector.load %arg4[%c0_3, %c1, %c0_4, %c0_5] : memref<1x4x16x16xf32, #tpu.memory_space<vmem>>, vector<1x1x16x16xf32>
    %6 = vector.shape_cast %5 : vector<1x1x16x16xf32> to vector<16x16xf32>
    %7 = vector.extract_strided_slice %6 {offsets = [0, 0], sizes = [16, 14], strides = [1, 1]} : vector<16x16xf32> to vector<16x14xf32>
    %8 = vector.extract_strided_slice %6 {offsets = [0, 1], sizes = [16, 14], strides = [1, 1]} : vector<16x16xf32> to vector<16x14xf32>
    %9 = vector.extract_strided_slice %6 {offsets = [0, 2], sizes = [16, 14], strides = [1, 1]} : vector<16x16xf32> to vector<16x14xf32>
    %c0_6 = arith.constant 0 : index
    %c2 = arith.constant 2 : index
    %c0_7 = arith.constant 0 : index
    %c0_8 = arith.constant 0 : index
    %10 = vector.load %arg4[%c0_6, %c2, %c0_7, %c0_8] : memref<1x4x16x16xf32, #tpu.memory_space<vmem>>, vector<1x1x16x16xf32>
    %11 = vector.shape_cast %10 : vector<1x1x16x16xf32> to vector<16x16xf32>
    %12 = vector.extract_strided_slice %11 {offsets = [0, 0], sizes = [16, 14], strides = [1, 1]} : vector<16x16xf32> to vector<16x14xf32>
    %13 = vector.extract_strided_slice %11 {offsets = [0, 1], sizes = [16, 14], strides = [1, 1]} : vector<16x16xf32> to vector<16x14xf32>
    %14 = vector.extract_strided_slice %11 {offsets = [0, 2], sizes = [16, 14], strides = [1, 1]} : vector<16x16xf32> to vector<16x14xf32>
    %c0_9 = arith.constant 0 : index
    %c3 = arith.constant 3 : index
    %c0_10 = arith.constant 0 : index
    %c0_11 = arith.constant 0 : index
    %15 = vector.load %arg4[%c0_9, %c3, %c0_10, %c0_11] : memref<1x4x16x16xf32, #tpu.memory_space<vmem>>, vector<1x1x16x16xf32>
    %16 = vector.shape_cast %15 : vector<1x1x16x16xf32> to vector<16x16xf32>
    %17 = vector.extract_strided_slice %16 {offsets = [0, 0], sizes = [16, 14], strides = [1, 1]} : vector<16x16xf32> to vector<16x14xf32>
    %18 = vector.extract_strided_slice %16 {offsets = [0, 1], sizes = [16, 14], strides = [1, 1]} : vector<16x16xf32> to vector<16x14xf32>
    %19 = vector.extract_strided_slice %16 {offsets = [0, 2], sizes = [16, 14], strides = [1, 1]} : vector<16x16xf32> to vector<16x14xf32>
    %c0_12 = arith.constant 0 : index
    %20 = memref.load %arg2[%c0_12] : memref<96xf32, #tpu.memory_space<smem>>
    %21 = vector.broadcast %20 : f32 to vector<16x14xf32>
    %22 = arith.mulf %2, %21 : vector<16x14xf32>
    %c1_13 = arith.constant 1 : index
    %23 = memref.load %arg2[%c1_13] : memref<96xf32, #tpu.memory_space<smem>>
    %24 = vector.broadcast %23 : f32 to vector<16x14xf32>
    %25 = arith.mulf %3, %24 : vector<16x14xf32>
    %26 = arith.addf %22, %25 : vector<16x14xf32>
    %c2_14 = arith.constant 2 : index
    %27 = memref.load %arg2[%c2_14] : memref<96xf32, #tpu.memory_space<smem>>
    %28 = vector.broadcast %27 : f32 to vector<16x14xf32>
    %29 = arith.mulf %4, %28 : vector<16x14xf32>
    %30 = arith.addf %26, %29 : vector<16x14xf32>
    %c3_15 = arith.constant 3 : index
    %31 = memref.load %arg2[%c3_15] : memref<96xf32, #tpu.memory_space<smem>>
    %32 = vector.broadcast %31 : f32 to vector<16x14xf32>
    %33 = arith.mulf %7, %32 : vector<16x14xf32>
    %34 = arith.addf %30, %33 : vector<16x14xf32>
    %c4 = arith.constant 4 : index
    %35 = memref.load %arg2[%c4] : memref<96xf32, #tpu.memory_space<smem>>
    %36 = vector.broadcast %35 : f32 to vector<16x14xf32>
    %37 = arith.mulf %8, %36 : vector<16x14xf32>
    %38 = arith.addf %34, %37 : vector<16x14xf32>
    %c5 = arith.constant 5 : index
    %39 = memref.load %arg2[%c5] : memref<96xf32, #tpu.memory_space<smem>>
    %40 = vector.broadcast %39 : f32 to vector<16x14xf32>
    %41 = arith.mulf %9, %40 : vector<16x14xf32>
    %42 = arith.addf %38, %41 : vector<16x14xf32>
    %c6 = arith.constant 6 : index
    %43 = memref.load %arg2[%c6] : memref<96xf32, #tpu.memory_space<smem>>
    %44 = vector.broadcast %43 : f32 to vector<16x14xf32>
    %45 = arith.mulf %12, %44 : vector<16x14xf32>
    %46 = arith.addf %42, %45 : vector<16x14xf32>
    %c7 = arith.constant 7 : index
    %47 = memref.load %arg2[%c7] : memref<96xf32, #tpu.memory_space<smem>>
    %48 = vector.broadcast %47 : f32 to vector<16x14xf32>
    %49 = arith.mulf %13, %48 : vector<16x14xf32>
    %50 = arith.addf %46, %49 : vector<16x14xf32>
    %c8 = arith.constant 8 : index
    %51 = memref.load %arg2[%c8] : memref<96xf32, #tpu.memory_space<smem>>
    %52 = vector.broadcast %51 : f32 to vector<16x14xf32>
    %53 = arith.mulf %14, %52 : vector<16x14xf32>
    %54 = arith.addf %50, %53 : vector<16x14xf32>
    %c9 = arith.constant 9 : index
    %55 = memref.load %arg2[%c9] : memref<96xf32, #tpu.memory_space<smem>>
    %56 = vector.broadcast %55 : f32 to vector<16x14xf32>
    %57 = arith.mulf %17, %56 : vector<16x14xf32>
    %58 = arith.addf %54, %57 : vector<16x14xf32>
    %c10 = arith.constant 10 : index
    %59 = memref.load %arg2[%c10] : memref<96xf32, #tpu.memory_space<smem>>
    %60 = vector.broadcast %59 : f32 to vector<16x14xf32>
    %61 = arith.mulf %18, %60 : vector<16x14xf32>
    %62 = arith.addf %58, %61 : vector<16x14xf32>
    %c11 = arith.constant 11 : index
    %63 = memref.load %arg2[%c11] : memref<96xf32, #tpu.memory_space<smem>>
    %64 = vector.broadcast %63 : f32 to vector<16x14xf32>
    %65 = arith.mulf %19, %64 : vector<16x14xf32>
    %66 = arith.addf %62, %65 : vector<16x14xf32>
    %c0_16 = arith.constant 0 : index
    %67 = memref.load %arg3[%c0_16] : memref<8xf32, #tpu.memory_space<smem>>
    %68 = vector.broadcast %67 : f32 to vector<16x14xf32>
    %69 = arith.addf %66, %68 : vector<16x14xf32>
    %cst = arith.constant 0.000000e+00 : f32
    %70 = vector.broadcast %cst : f32 to vector<16x14xf32>
    %71 = arith.maximumf %69, %70 : vector<16x14xf32>
    %c0_17 = arith.constant 0 : index
    %c0_18 = arith.constant 0 : index
    %c0_19 = arith.constant 0 : index
    %c0_20 = arith.constant 0 : index
    %72 = vector.load %arg5[%c0_17, %c0_18, %c0_19, %c0_20] : memref<1x8x16x14xf32, #tpu.memory_space<vmem>>, vector<1x1x16x14xf32>
    %73 = vector.shape_cast %72 : vector<1x1x16x14xf32> to vector<16x14xf32>
    %74 = vector.shape_cast %71 : vector<16x14xf32> to vector<1x1x16x14xf32>
    tpu.vector_store %arg5[%c0_17, %c0_18, %c0_19, %c0_20], %74 {strides = array<i32>} : memref<1x8x16x14xf32, #tpu.memory_space<vmem>>, vector<1x1x16x14xf32>,
    %c12 = arith.constant 12 : index
    %75 = memref.load %arg2[%c12] : memref<96xf32, #tpu.memory_space<smem>>
    %76 = vector.broadcast %75 : f32 to vector<16x14xf32>
    %77 = arith.mulf %2, %76 : vector<16x14xf32>
    %c13 = arith.constant 13 : index
    %78 = memref.load %arg2[%c13] : memref<96xf32, #tpu.memory_space<smem>>
    %79 = vector.broadcast %78 : f32 to vector<16x14xf32>
    %80 = arith.mulf %3, %79 : vector<16x14xf32>
    %81 = arith.addf %77, %80 : vector<16x14xf32>
    %c14 = arith.constant 14 : index
    %82 = memref.load %arg2[%c14] : memref<96xf32, #tpu.memory_space<smem>>
    %83 = vector.broadcast %82 : f32 to vector<16x14xf32>
    %84 = arith.mulf %4, %83 : vector<16x14xf32>
    %85 = arith.addf %81, %84 : vector<16x14xf32>
    %c15 = arith.constant 15 : index
    %86 = memref.load %arg2[%c15] : memref<96xf32, #tpu.memory_space<smem>>
    %87 = vector.broadcast %86 : f32 to vector<16x14xf32>
    %88 = arith.mulf %7, %87 : vector<16x14xf32>
    %89 = arith.addf %85, %88 : vector<16x14xf32>
    %c16 = arith.constant 16 : index
    %90 = memref.load %arg2[%c16] : memref<96xf32, #tpu.memory_space<smem>>
    %91 = vector.broadcast %90 : f32 to vector<16x14xf32>
    %92 = arith.mulf %8, %91 : vector<16x14xf32>
    %93 = arith.addf %89, %92 : vector<16x14xf32>
    %c17 = arith.constant 17 : index
    %94 = memref.load %arg2[%c17] : memref<96xf32, #tpu.memory_space<smem>>
    %95 = vector.broadcast %94 : f32 to vector<16x14xf32>
    %96 = arith.mulf %9, %95 : vector<16x14xf32>
    %97 = arith.addf %93, %96 : vector<16x14xf32>
    %c18 = arith.constant 18 : index
    %98 = memref.load %arg2[%c18] : memref<96xf32, #tpu.memory_space<smem>>
    %99 = vector.broadcast %98 : f32 to vector<16x14xf32>
    %100 = arith.mulf %12, %99 : vector<16x14xf32>
    %101 = arith.addf %97, %100 : vector<16x14xf32>
    %c19 = arith.constant 19 : index
    %102 = memref.load %arg2[%c19] : memref<96xf32, #tpu.memory_space<smem>>
    %103 = vector.broadcast %102 : f32 to vector<16x14xf32>
    %104 = arith.mulf %13, %103 : vector<16x14xf32>
    %105 = arith.addf %101, %104 : vector<16x14xf32>
    %c20 = arith.constant 20 : index
    %106 = memref.load %arg2[%c20] : memref<96xf32, #tpu.memory_space<smem>>
    %107 = vector.broadcast %106 : f32 to vector<16x14xf32>
    %108 = arith.mulf %14, %107 : vector<16x14xf32>
    %109 = arith.addf %105, %108 : vector<16x14xf32>
    %c21 = arith.constant 21 : index
    %110 = memref.load %arg2[%c21] : memref<96xf32, #tpu.memory_space<smem>>
    %111 = vector.broadcast %110 : f32 to vector<16x14xf32>
    %112 = arith.mulf %17, %111 : vector<16x14xf32>
    %113 = arith.addf %109, %112 : vector<16x14xf32>
    %c22 = arith.constant 22 : index
    %114 = memref.load %arg2[%c22] : memref<96xf32, #tpu.memory_space<smem>>
    %115 = vector.broadcast %114 : f32 to vector<16x14xf32>
    %116 = arith.mulf %18, %115 : vector<16x14xf32>
    %117 = arith.addf %113, %116 : vector<16x14xf32>
    %c23 = arith.constant 23 : index
    %118 = memref.load %arg2[%c23] : memref<96xf32, #tpu.memory_space<smem>>
    %119 = vector.broadcast %118 : f32 to vector<16x14xf32>
    %120 = arith.mulf %19, %119 : vector<16x14xf32>
    %121 = arith.addf %117, %120 : vector<16x14xf32>
    %c1_21 = arith.constant 1 : index
    %122 = memref.load %arg3[%c1_21] : memref<8xf32, #tpu.memory_space<smem>>
    %123 = vector.broadcast %122 : f32 to vector<16x14xf32>
    %124 = arith.addf %121, %123 : vector<16x14xf32>
    %cst_22 = arith.constant 0.000000e+00 : f32
    %125 = vector.broadcast %cst_22 : f32 to vector<16x14xf32>
    %126 = arith.maximumf %124, %125 : vector<16x14xf32>
    %c0_23 = arith.constant 0 : index
    %c1_24 = arith.constant 1 : index
    %c0_25 = arith.constant 0 : index
    %c0_26 = arith.constant 0 : index
    %127 = vector.load %arg5[%c0_23, %c1_24, %c0_25, %c0_26] : memref<1x8x16x14xf32, #tpu.memory_space<vmem>>, vector<1x1x16x14xf32>
    %128 = vector.shape_cast %127 : vector<1x1x16x14xf32> to vector<16x14xf32>
    %129 = vector.shape_cast %126 : vector<16x14xf32> to vector<1x1x16x14xf32>
    tpu.vector_store %arg5[%c0_23, %c1_24, %c0_25, %c0_26], %129 {strides = array<i32>} : memref<1x8x16x14xf32, #tpu.memory_space<vmem>>, vector<1x1x16x14xf32>,
    %c24 = arith.constant 24 : index
    %130 = memref.load %arg2[%c24] : memref<96xf32, #tpu.memory_space<smem>>
    %131 = vector.broadcast %130 : f32 to vector<16x14xf32>
    %132 = arith.mulf %2, %131 : vector<16x14xf32>
    %c25 = arith.constant 25 : index
    %133 = memref.load %arg2[%c25] : memref<96xf32, #tpu.memory_space<smem>>
    %134 = vector.broadcast %133 : f32 to vector<16x14xf32>
    %135 = arith.mulf %3, %134 : vector<16x14xf32>
    %136 = arith.addf %132, %135 : vector<16x14xf32>
    %c26 = arith.constant 26 : index
    %137 = memref.load %arg2[%c26] : memref<96xf32, #tpu.memory_space<smem>>
    %138 = vector.broadcast %137 : f32 to vector<16x14xf32>
    %139 = arith.mulf %4, %138 : vector<16x14xf32>
    %140 = arith.addf %136, %139 : vector<16x14xf32>
    %c27 = arith.constant 27 : index
    %141 = memref.load %arg2[%c27] : memref<96xf32, #tpu.memory_space<smem>>
    %142 = vector.broadcast %141 : f32 to vector<16x14xf32>
    %143 = arith.mulf %7, %142 : vector<16x14xf32>
    %144 = arith.addf %140, %143 : vector<16x14xf32>
    %c28 = arith.constant 28 : index
    %145 = memref.load %arg2[%c28] : memref<96xf32, #tpu.memory_space<smem>>
    %146 = vector.broadcast %145 : f32 to vector<16x14xf32>
    %147 = arith.mulf %8, %146 : vector<16x14xf32>
    %148 = arith.addf %144, %147 : vector<16x14xf32>
    %c29 = arith.constant 29 : index
    %149 = memref.load %arg2[%c29] : memref<96xf32, #tpu.memory_space<smem>>
    %150 = vector.broadcast %149 : f32 to vector<16x14xf32>
    %151 = arith.mulf %9, %150 : vector<16x14xf32>
    %152 = arith.addf %148, %151 : vector<16x14xf32>
    %c30 = arith.constant 30 : index
    %153 = memref.load %arg2[%c30] : memref<96xf32, #tpu.memory_space<smem>>
    %154 = vector.broadcast %153 : f32 to vector<16x14xf32>
    %155 = arith.mulf %12, %154 : vector<16x14xf32>
    %156 = arith.addf %152, %155 : vector<16x14xf32>
    %c31 = arith.constant 31 : index
    %157 = memref.load %arg2[%c31] : memref<96xf32, #tpu.memory_space<smem>>
    %158 = vector.broadcast %157 : f32 to vector<16x14xf32>
    %159 = arith.mulf %13, %158 : vector<16x14xf32>
    %160 = arith.addf %156, %159 : vector<16x14xf32>
    %c32 = arith.constant 32 : index
    %161 = memref.load %arg2[%c32] : memref<96xf32, #tpu.memory_space<smem>>
    %162 = vector.broadcast %161 : f32 to vector<16x14xf32>
    %163 = arith.mulf %14, %162 : vector<16x14xf32>
    %164 = arith.addf %160, %163 : vector<16x14xf32>
    %c33 = arith.constant 33 : index
    %165 = memref.load %arg2[%c33] : memref<96xf32, #tpu.memory_space<smem>>
    %166 = vector.broadcast %165 : f32 to vector<16x14xf32>
    %167 = arith.mulf %17, %166 : vector<16x14xf32>
    %168 = arith.addf %164, %167 : vector<16x14xf32>
    %c34 = arith.constant 34 : index
    %169 = memref.load %arg2[%c34] : memref<96xf32, #tpu.memory_space<smem>>
    %170 = vector.broadcast %169 : f32 to vector<16x14xf32>
    %171 = arith.mulf %18, %170 : vector<16x14xf32>
    %172 = arith.addf %168, %171 : vector<16x14xf32>
    %c35 = arith.constant 35 : index
    %173 = memref.load %arg2[%c35] : memref<96xf32, #tpu.memory_space<smem>>
    %174 = vector.broadcast %173 : f32 to vector<16x14xf32>
    %175 = arith.mulf %19, %174 : vector<16x14xf32>
    %176 = arith.addf %172, %175 : vector<16x14xf32>
    %c2_27 = arith.constant 2 : index
    %177 = memref.load %arg3[%c2_27] : memref<8xf32, #tpu.memory_space<smem>>
    %178 = vector.broadcast %177 : f32 to vector<16x14xf32>
    %179 = arith.addf %176, %178 : vector<16x14xf32>
    %cst_28 = arith.constant 0.000000e+00 : f32
    %180 = vector.broadcast %cst_28 : f32 to vector<16x14xf32>
    %181 = arith.maximumf %179, %180 : vector<16x14xf32>
    %c0_29 = arith.constant 0 : index
    %c2_30 = arith.constant 2 : index
    %c0_31 = arith.constant 0 : index
    %c0_32 = arith.constant 0 : index
    %182 = vector.load %arg5[%c0_29, %c2_30, %c0_31, %c0_32] : memref<1x8x16x14xf32, #tpu.memory_space<vmem>>, vector<1x1x16x14xf32>
    %183 = vector.shape_cast %182 : vector<1x1x16x14xf32> to vector<16x14xf32>
    %184 = vector.shape_cast %181 : vector<16x14xf32> to vector<1x1x16x14xf32>
    tpu.vector_store %arg5[%c0_29, %c2_30, %c0_31, %c0_32], %184 {strides = array<i32>} : memref<1x8x16x14xf32, #tpu.memory_space<vmem>>, vector<1x1x16x14xf32>,
    %c36 = arith.constant 36 : index
    %185 = memref.load %arg2[%c36] : memref<96xf32, #tpu.memory_space<smem>>
    %186 = vector.broadcast %185 : f32 to vector<16x14xf32>
    %187 = arith.mulf %2, %186 : vector<16x14xf32>
    %c37 = arith.constant 37 : index
    %188 = memref.load %arg2[%c37] : memref<96xf32, #tpu.memory_space<smem>>
    %189 = vector.broadcast %188 : f32 to vector<16x14xf32>
    %190 = arith.mulf %3, %189 : vector<16x14xf32>
    %191 = arith.addf %187, %190 : vector<16x14xf32>
    %c38 = arith.constant 38 : index
    %192 = memref.load %arg2[%c38] : memref<96xf32, #tpu.memory_space<smem>>
    %193 = vector.broadcast %192 : f32 to vector<16x14xf32>
    %194 = arith.mulf %4, %193 : vector<16x14xf32>
    %195 = arith.addf %191, %194 : vector<16x14xf32>
    %c39 = arith.constant 39 : index
    %196 = memref.load %arg2[%c39] : memref<96xf32, #tpu.memory_space<smem>>
    %197 = vector.broadcast %196 : f32 to vector<16x14xf32>
    %198 = arith.mulf %7, %197 : vector<16x14xf32>
    %199 = arith.addf %195, %198 : vector<16x14xf32>
    %c40 = arith.constant 40 : index
    %200 = memref.load %arg2[%c40] : memref<96xf32, #tpu.memory_space<smem>>
    %201 = vector.broadcast %200 : f32 to vector<16x14xf32>
    %202 = arith.mulf %8, %201 : vector<16x14xf32>
    %203 = arith.addf %199, %202 : vector<16x14xf32>
    %c41 = arith.constant 41 : index
    %204 = memref.load %arg2[%c41] : memref<96xf32, #tpu.memory_space<smem>>
    %205 = vector.broadcast %204 : f32 to vector<16x14xf32>
    %206 = arith.mulf %9, %205 : vector<16x14xf32>
    %207 = arith.addf %203, %206 : vector<16x14xf32>
    %c42 = arith.constant 42 : index
    %208 = memref.load %arg2[%c42] : memref<96xf32, #tpu.memory_space<smem>>
    %209 = vector.broadcast %208 : f32 to vector<16x14xf32>
    %210 = arith.mulf %12, %209 : vector<16x14xf32>
    %211 = arith.addf %207, %210 : vector<16x14xf32>
    %c43 = arith.constant 43 : index
    %212 = memref.load %arg2[%c43] : memref<96xf32, #tpu.memory_space<smem>>
    %213 = vector.broadcast %212 : f32 to vector<16x14xf32>
    %214 = arith.mulf %13, %213 : vector<16x14xf32>
    %215 = arith.addf %211, %214 : vector<16x14xf32>
    %c44 = arith.constant 44 : index
    %216 = memref.load %arg2[%c44] : memref<96xf32, #tpu.memory_space<smem>>
    %217 = vector.broadcast %216 : f32 to vector<16x14xf32>
    %218 = arith.mulf %14, %217 : vector<16x14xf32>
    %219 = arith.addf %215, %218 : vector<16x14xf32>
    %c45 = arith.constant 45 : index
    %220 = memref.load %arg2[%c45] : memref<96xf32, #tpu.memory_space<smem>>
    %221 = vector.broadcast %220 : f32 to vector<16x14xf32>
    %222 = arith.mulf %17, %221 : vector<16x14xf32>
    %223 = arith.addf %219, %222 : vector<16x14xf32>
    %c46 = arith.constant 46 : index
    %224 = memref.load %arg2[%c46] : memref<96xf32, #tpu.memory_space<smem>>
    %225 = vector.broadcast %224 : f32 to vector<16x14xf32>
    %226 = arith.mulf %18, %225 : vector<16x14xf32>
    %227 = arith.addf %223, %226 : vector<16x14xf32>
    %c47 = arith.constant 47 : index
    %228 = memref.load %arg2[%c47] : memref<96xf32, #tpu.memory_space<smem>>
    %229 = vector.broadcast %228 : f32 to vector<16x14xf32>
    %230 = arith.mulf %19, %229 : vector<16x14xf32>
    %231 = arith.addf %227, %230 : vector<16x14xf32>
    %c3_33 = arith.constant 3 : index
    %232 = memref.load %arg3[%c3_33] : memref<8xf32, #tpu.memory_space<smem>>
    %233 = vector.broadcast %232 : f32 to vector<16x14xf32>
    %234 = arith.addf %231, %233 : vector<16x14xf32>
    %cst_34 = arith.constant 0.000000e+00 : f32
    %235 = vector.broadcast %cst_34 : f32 to vector<16x14xf32>
    %236 = arith.maximumf %234, %235 : vector<16x14xf32>
    %c0_35 = arith.constant 0 : index
    %c3_36 = arith.constant 3 : index
    %c0_37 = arith.constant 0 : index
    %c0_38 = arith.constant 0 : index
    %237 = vector.load %arg5[%c0_35, %c3_36, %c0_37, %c0_38] : memref<1x8x16x14xf32, #tpu.memory_space<vmem>>, vector<1x1x16x14xf32>
    %238 = vector.shape_cast %237 : vector<1x1x16x14xf32> to vector<16x14xf32>
    %239 = vector.shape_cast %236 : vector<16x14xf32> to vector<1x1x16x14xf32>
    tpu.vector_store %arg5[%c0_35, %c3_36, %c0_37, %c0_38], %239 {strides = array<i32>} : memref<1x8x16x14xf32, #tpu.memory_space<vmem>>, vector<1x1x16x14xf32>,
    %c48 = arith.constant 48 : index
    %240 = memref.load %arg2[%c48] : memref<96xf32, #tpu.memory_space<smem>>
    %241 = vector.broadcast %240 : f32 to vector<16x14xf32>
    %242 = arith.mulf %2, %241 : vector<16x14xf32>
    %c49 = arith.constant 49 : index
    %243 = memref.load %arg2[%c49] : memref<96xf32, #tpu.memory_space<smem>>
    %244 = vector.broadcast %243 : f32 to vector<16x14xf32>
    %245 = arith.mulf %3, %244 : vector<16x14xf32>
    %246 = arith.addf %242, %245 : vector<16x14xf32>
    %c50 = arith.constant 50 : index
    %247 = memref.load %arg2[%c50] : memref<96xf32, #tpu.memory_space<smem>>
    %248 = vector.broadcast %247 : f32 to vector<16x14xf32>
    %249 = arith.mulf %4, %248 : vector<16x14xf32>
    %250 = arith.addf %246, %249 : vector<16x14xf32>
    %c51 = arith.constant 51 : index
    %251 = memref.load %arg2[%c51] : memref<96xf32, #tpu.memory_space<smem>>
    %252 = vector.broadcast %251 : f32 to vector<16x14xf32>
    %253 = arith.mulf %7, %252 : vector<16x14xf32>
    %254 = arith.addf %250, %253 : vector<16x14xf32>
    %c52 = arith.constant 52 : index
    %255 = memref.load %arg2[%c52] : memref<96xf32, #tpu.memory_space<smem>>
    %256 = vector.broadcast %255 : f32 to vector<16x14xf32>
    %257 = arith.mulf %8, %256 : vector<16x14xf32>
    %258 = arith.addf %254, %257 : vector<16x14xf32>
    %c53 = arith.constant 53 : index
    %259 = memref.load %arg2[%c53] : memref<96xf32, #tpu.memory_space<smem>>
    %260 = vector.broadcast %259 : f32 to vector<16x14xf32>
    %261 = arith.mulf %9, %260 : vector<16x14xf32>
    %262 = arith.addf %258, %261 : vector<16x14xf32>
    %c54 = arith.constant 54 : index
    %263 = memref.load %arg2[%c54] : memref<96xf32, #tpu.memory_space<smem>>
    %264 = vector.broadcast %263 : f32 to vector<16x14xf32>
    %265 = arith.mulf %12, %264 : vector<16x14xf32>
    %266 = arith.addf %262, %265 : vector<16x14xf32>
    %c55 = arith.constant 55 : index
    %267 = memref.load %arg2[%c55] : memref<96xf32, #tpu.memory_space<smem>>
    %268 = vector.broadcast %267 : f32 to vector<16x14xf32>
    %269 = arith.mulf %13, %268 : vector<16x14xf32>
    %270 = arith.addf %266, %269 : vector<16x14xf32>
    %c56 = arith.constant 56 : index
    %271 = memref.load %arg2[%c56] : memref<96xf32, #tpu.memory_space<smem>>
    %272 = vector.broadcast %271 : f32 to vector<16x14xf32>
    %273 = arith.mulf %14, %272 : vector<16x14xf32>
    %274 = arith.addf %270, %273 : vector<16x14xf32>
    %c57 = arith.constant 57 : index
    %275 = memref.load %arg2[%c57] : memref<96xf32, #tpu.memory_space<smem>>
    %276 = vector.broadcast %275 : f32 to vector<16x14xf32>
    %277 = arith.mulf %17, %276 : vector<16x14xf32>
    %278 = arith.addf %274, %277 : vector<16x14xf32>
    %c58 = arith.constant 58 : index
    %279 = memref.load %arg2[%c58] : memref<96xf32, #tpu.memory_space<smem>>
    %280 = vector.broadcast %279 : f32 to vector<16x14xf32>
    %281 = arith.mulf %18, %280 : vector<16x14xf32>
    %282 = arith.addf %278, %281 : vector<16x14xf32>
    %c59 = arith.constant 59 : index
    %283 = memref.load %arg2[%c59] : memref<96xf32, #tpu.memory_space<smem>>
    %284 = vector.broadcast %283 : f32 to vector<16x14xf32>
    %285 = arith.mulf %19, %284 : vector<16x14xf32>
    %286 = arith.addf %282, %285 : vector<16x14xf32>
    %c4_39 = arith.constant 4 : index
    %287 = memref.load %arg3[%c4_39] : memref<8xf32, #tpu.memory_space<smem>>
    %288 = vector.broadcast %287 : f32 to vector<16x14xf32>
    %289 = arith.addf %286, %288 : vector<16x14xf32>
    %cst_40 = arith.constant 0.000000e+00 : f32
    %290 = vector.broadcast %cst_40 : f32 to vector<16x14xf32>
    %291 = arith.maximumf %289, %290 : vector<16x14xf32>
    %c0_41 = arith.constant 0 : index
    %c4_42 = arith.constant 4 : index
    %c0_43 = arith.constant 0 : index
    %c0_44 = arith.constant 0 : index
    %292 = vector.load %arg5[%c0_41, %c4_42, %c0_43, %c0_44] : memref<1x8x16x14xf32, #tpu.memory_space<vmem>>, vector<1x1x16x14xf32>
    %293 = vector.shape_cast %292 : vector<1x1x16x14xf32> to vector<16x14xf32>
    %294 = vector.shape_cast %291 : vector<16x14xf32> to vector<1x1x16x14xf32>
    tpu.vector_store %arg5[%c0_41, %c4_42, %c0_43, %c0_44], %294 {strides = array<i32>} : memref<1x8x16x14xf32, #tpu.memory_space<vmem>>, vector<1x1x16x14xf32>,
    %c60 = arith.constant 60 : index
    %295 = memref.load %arg2[%c60] : memref<96xf32, #tpu.memory_space<smem>>
    %296 = vector.broadcast %295 : f32 to vector<16x14xf32>
    %297 = arith.mulf %2, %296 : vector<16x14xf32>
    %c61 = arith.constant 61 : index
    %298 = memref.load %arg2[%c61] : memref<96xf32, #tpu.memory_space<smem>>
    %299 = vector.broadcast %298 : f32 to vector<16x14xf32>
    %300 = arith.mulf %3, %299 : vector<16x14xf32>
    %301 = arith.addf %297, %300 : vector<16x14xf32>
    %c62 = arith.constant 62 : index
    %302 = memref.load %arg2[%c62] : memref<96xf32, #tpu.memory_space<smem>>
    %303 = vector.broadcast %302 : f32 to vector<16x14xf32>
    %304 = arith.mulf %4, %303 : vector<16x14xf32>
    %305 = arith.addf %301, %304 : vector<16x14xf32>
    %c63 = arith.constant 63 : index
    %306 = memref.load %arg2[%c63] : memref<96xf32, #tpu.memory_space<smem>>
    %307 = vector.broadcast %306 : f32 to vector<16x14xf32>
    %308 = arith.mulf %7, %307 : vector<16x14xf32>
    %309 = arith.addf %305, %308 : vector<16x14xf32>
    %c64 = arith.constant 64 : index
    %310 = memref.load %arg2[%c64] : memref<96xf32, #tpu.memory_space<smem>>
    %311 = vector.broadcast %310 : f32 to vector<16x14xf32>
    %312 = arith.mulf %8, %311 : vector<16x14xf32>
    %313 = arith.addf %309, %312 : vector<16x14xf32>
    %c65 = arith.constant 65 : index
    %314 = memref.load %arg2[%c65] : memref<96xf32, #tpu.memory_space<smem>>
    %315 = vector.broadcast %314 : f32 to vector<16x14xf32>
    %316 = arith.mulf %9, %315 : vector<16x14xf32>
    %317 = arith.addf %313, %316 : vector<16x14xf32>
    %c66 = arith.constant 66 : index
    %318 = memref.load %arg2[%c66] : memref<96xf32, #tpu.memory_space<smem>>
    %319 = vector.broadcast %318 : f32 to vector<16x14xf32>
    %320 = arith.mulf %12, %319 : vector<16x14xf32>
    %321 = arith.addf %317, %320 : vector<16x14xf32>
    %c67 = arith.constant 67 : index
    %322 = memref.load %arg2[%c67] : memref<96xf32, #tpu.memory_space<smem>>
    %323 = vector.broadcast %322 : f32 to vector<16x14xf32>
    %324 = arith.mulf %13, %323 : vector<16x14xf32>
    %325 = arith.addf %321, %324 : vector<16x14xf32>
    %c68 = arith.constant 68 : index
    %326 = memref.load %arg2[%c68] : memref<96xf32, #tpu.memory_space<smem>>
    %327 = vector.broadcast %326 : f32 to vector<16x14xf32>
    %328 = arith.mulf %14, %327 : vector<16x14xf32>
    %329 = arith.addf %325, %328 : vector<16x14xf32>
    %c69 = arith.constant 69 : index
    %330 = memref.load %arg2[%c69] : memref<96xf32, #tpu.memory_space<smem>>
    %331 = vector.broadcast %330 : f32 to vector<16x14xf32>
    %332 = arith.mulf %17, %331 : vector<16x14xf32>
    %333 = arith.addf %329, %332 : vector<16x14xf32>
    %c70 = arith.constant 70 : index
    %334 = memref.load %arg2[%c70] : memref<96xf32, #tpu.memory_space<smem>>
    %335 = vector.broadcast %334 : f32 to vector<16x14xf32>
    %336 = arith.mulf %18, %335 : vector<16x14xf32>
    %337 = arith.addf %333, %336 : vector<16x14xf32>
    %c71 = arith.constant 71 : index
    %338 = memref.load %arg2[%c71] : memref<96xf32, #tpu.memory_space<smem>>
    %339 = vector.broadcast %338 : f32 to vector<16x14xf32>
    %340 = arith.mulf %19, %339 : vector<16x14xf32>
    %341 = arith.addf %337, %340 : vector<16x14xf32>
    %c5_45 = arith.constant 5 : index
    %342 = memref.load %arg3[%c5_45] : memref<8xf32, #tpu.memory_space<smem>>
    %343 = vector.broadcast %342 : f32 to vector<16x14xf32>
    %344 = arith.addf %341, %343 : vector<16x14xf32>
    %cst_46 = arith.constant 0.000000e+00 : f32
    %345 = vector.broadcast %cst_46 : f32 to vector<16x14xf32>
    %346 = arith.maximumf %344, %345 : vector<16x14xf32>
    %c0_47 = arith.constant 0 : index
    %c5_48 = arith.constant 5 : index
    %c0_49 = arith.constant 0 : index
    %c0_50 = arith.constant 0 : index
    %347 = vector.load %arg5[%c0_47, %c5_48, %c0_49, %c0_50] : memref<1x8x16x14xf32, #tpu.memory_space<vmem>>, vector<1x1x16x14xf32>
    %348 = vector.shape_cast %347 : vector<1x1x16x14xf32> to vector<16x14xf32>
    %349 = vector.shape_cast %346 : vector<16x14xf32> to vector<1x1x16x14xf32>
    tpu.vector_store %arg5[%c0_47, %c5_48, %c0_49, %c0_50], %349 {strides = array<i32>} : memref<1x8x16x14xf32, #tpu.memory_space<vmem>>, vector<1x1x16x14xf32>,
    %c72 = arith.constant 72 : index
    %350 = memref.load %arg2[%c72] : memref<96xf32, #tpu.memory_space<smem>>
    %351 = vector.broadcast %350 : f32 to vector<16x14xf32>
    %352 = arith.mulf %2, %351 : vector<16x14xf32>
    %c73 = arith.constant 73 : index
    %353 = memref.load %arg2[%c73] : memref<96xf32, #tpu.memory_space<smem>>
    %354 = vector.broadcast %353 : f32 to vector<16x14xf32>
    %355 = arith.mulf %3, %354 : vector<16x14xf32>
    %356 = arith.addf %352, %355 : vector<16x14xf32>
    %c74 = arith.constant 74 : index
    %357 = memref.load %arg2[%c74] : memref<96xf32, #tpu.memory_space<smem>>
    %358 = vector.broadcast %357 : f32 to vector<16x14xf32>
    %359 = arith.mulf %4, %358 : vector<16x14xf32>
    %360 = arith.addf %356, %359 : vector<16x14xf32>
    %c75 = arith.constant 75 : index
    %361 = memref.load %arg2[%c75] : memref<96xf32, #tpu.memory_space<smem>>
    %362 = vector.broadcast %361 : f32 to vector<16x14xf32>
    %363 = arith.mulf %7, %362 : vector<16x14xf32>
    %364 = arith.addf %360, %363 : vector<16x14xf32>
    %c76 = arith.constant 76 : index
    %365 = memref.load %arg2[%c76] : memref<96xf32, #tpu.memory_space<smem>>
    %366 = vector.broadcast %365 : f32 to vector<16x14xf32>
    %367 = arith.mulf %8, %366 : vector<16x14xf32>
    %368 = arith.addf %364, %367 : vector<16x14xf32>
    %c77 = arith.constant 77 : index
    %369 = memref.load %arg2[%c77] : memref<96xf32, #tpu.memory_space<smem>>
    %370 = vector.broadcast %369 : f32 to vector<16x14xf32>
    %371 = arith.mulf %9, %370 : vector<16x14xf32>
    %372 = arith.addf %368, %371 : vector<16x14xf32>
    %c78 = arith.constant 78 : index
    %373 = memref.load %arg2[%c78] : memref<96xf32, #tpu.memory_space<smem>>
    %374 = vector.broadcast %373 : f32 to vector<16x14xf32>
    %375 = arith.mulf %12, %374 : vector<16x14xf32>
    %376 = arith.addf %372, %375 : vector<16x14xf32>
    %c79 = arith.constant 79 : index
    %377 = memref.load %arg2[%c79] : memref<96xf32, #tpu.memory_space<smem>>
    %378 = vector.broadcast %377 : f32 to vector<16x14xf32>
    %379 = arith.mulf %13, %378 : vector<16x14xf32>
    %380 = arith.addf %376, %379 : vector<16x14xf32>
    %c80 = arith.constant 80 : index
    %381 = memref.load %arg2[%c80] : memref<96xf32, #tpu.memory_space<smem>>
    %382 = vector.broadcast %381 : f32 to vector<16x14xf32>
    %383 = arith.mulf %14, %382 : vector<16x14xf32>
    %384 = arith.addf %380, %383 : vector<16x14xf32>
    %c81 = arith.constant 81 : index
    %385 = memref.load %arg2[%c81] : memref<96xf32, #tpu.memory_space<smem>>
    %386 = vector.broadcast %385 : f32 to vector<16x14xf32>
    %387 = arith.mulf %17, %386 : vector<16x14xf32>
    %388 = arith.addf %384, %387 : vector<16x14xf32>
    %c82 = arith.constant 82 : index
    %389 = memref.load %arg2[%c82] : memref<96xf32, #tpu.memory_space<smem>>
    %390 = vector.broadcast %389 : f32 to vector<16x14xf32>
    %391 = arith.mulf %18, %390 : vector<16x14xf32>
    %392 = arith.addf %388, %391 : vector<16x14xf32>
    %c83 = arith.constant 83 : index
    %393 = memref.load %arg2[%c83] : memref<96xf32, #tpu.memory_space<smem>>
    %394 = vector.broadcast %393 : f32 to vector<16x14xf32>
    %395 = arith.mulf %19, %394 : vector<16x14xf32>
    %396 = arith.addf %392, %395 : vector<16x14xf32>
    %c6_51 = arith.constant 6 : index
    %397 = memref.load %arg3[%c6_51] : memref<8xf32, #tpu.memory_space<smem>>
    %398 = vector.broadcast %397 : f32 to vector<16x14xf32>
    %399 = arith.addf %396, %398 : vector<16x14xf32>
    %cst_52 = arith.constant 0.000000e+00 : f32
    %400 = vector.broadcast %cst_52 : f32 to vector<16x14xf32>
    %401 = arith.maximumf %399, %400 : vector<16x14xf32>
    %c0_53 = arith.constant 0 : index
    %c6_54 = arith.constant 6 : index
    %c0_55 = arith.constant 0 : index
    %c0_56 = arith.constant 0 : index
    %402 = vector.load %arg5[%c0_53, %c6_54, %c0_55, %c0_56] : memref<1x8x16x14xf32, #tpu.memory_space<vmem>>, vector<1x1x16x14xf32>
    %403 = vector.shape_cast %402 : vector<1x1x16x14xf32> to vector<16x14xf32>
    %404 = vector.shape_cast %401 : vector<16x14xf32> to vector<1x1x16x14xf32>
    tpu.vector_store %arg5[%c0_53, %c6_54, %c0_55, %c0_56], %404 {strides = array<i32>} : memref<1x8x16x14xf32, #tpu.memory_space<vmem>>, vector<1x1x16x14xf32>,
    %c84 = arith.constant 84 : index
    %405 = memref.load %arg2[%c84] : memref<96xf32, #tpu.memory_space<smem>>
    %406 = vector.broadcast %405 : f32 to vector<16x14xf32>
    %407 = arith.mulf %2, %406 : vector<16x14xf32>
    %c85 = arith.constant 85 : index
    %408 = memref.load %arg2[%c85] : memref<96xf32, #tpu.memory_space<smem>>
    %409 = vector.broadcast %408 : f32 to vector<16x14xf32>
    %410 = arith.mulf %3, %409 : vector<16x14xf32>
    %411 = arith.addf %407, %410 : vector<16x14xf32>
    %c86 = arith.constant 86 : index
    %412 = memref.load %arg2[%c86] : memref<96xf32, #tpu.memory_space<smem>>
    %413 = vector.broadcast %412 : f32 to vector<16x14xf32>
    %414 = arith.mulf %4, %413 : vector<16x14xf32>
    %415 = arith.addf %411, %414 : vector<16x14xf32>
    %c87 = arith.constant 87 : index
    %416 = memref.load %arg2[%c87] : memref<96xf32, #tpu.memory_space<smem>>
    %417 = vector.broadcast %416 : f32 to vector<16x14xf32>
    %418 = arith.mulf %7, %417 : vector<16x14xf32>
    %419 = arith.addf %415, %418 : vector<16x14xf32>
    %c88 = arith.constant 88 : index
    %420 = memref.load %arg2[%c88] : memref<96xf32, #tpu.memory_space<smem>>
    %421 = vector.broadcast %420 : f32 to vector<16x14xf32>
    %422 = arith.mulf %8, %421 : vector<16x14xf32>
    %423 = arith.addf %419, %422 : vector<16x14xf32>
    %c89 = arith.constant 89 : index
    %424 = memref.load %arg2[%c89] : memref<96xf32, #tpu.memory_space<smem>>
    %425 = vector.broadcast %424 : f32 to vector<16x14xf32>
    %426 = arith.mulf %9, %425 : vector<16x14xf32>
    %427 = arith.addf %423, %426 : vector<16x14xf32>
    %c90 = arith.constant 90 : index
    %428 = memref.load %arg2[%c90] : memref<96xf32, #tpu.memory_space<smem>>
    %429 = vector.broadcast %428 : f32 to vector<16x14xf32>
    %430 = arith.mulf %12, %429 : vector<16x14xf32>
    %431 = arith.addf %427, %430 : vector<16x14xf32>
    %c91 = arith.constant 91 : index
    %432 = memref.load %arg2[%c91] : memref<96xf32, #tpu.memory_space<smem>>
    %433 = vector.broadcast %432 : f32 to vector<16x14xf32>
    %434 = arith.mulf %13, %433 : vector<16x14xf32>
    %435 = arith.addf %431, %434 : vector<16x14xf32>
    %c92 = arith.constant 92 : index
    %436 = memref.load %arg2[%c92] : memref<96xf32, #tpu.memory_space<smem>>
    %437 = vector.broadcast %436 : f32 to vector<16x14xf32>
    %438 = arith.mulf %14, %437 : vector<16x14xf32>
    %439 = arith.addf %435, %438 : vector<16x14xf32>
    %c93 = arith.constant 93 : index
    %440 = memref.load %arg2[%c93] : memref<96xf32, #tpu.memory_space<smem>>
    %441 = vector.broadcast %440 : f32 to vector<16x14xf32>
    %442 = arith.mulf %17, %441 : vector<16x14xf32>
    %443 = arith.addf %439, %442 : vector<16x14xf32>
    %c94 = arith.constant 94 : index
    %444 = memref.load %arg2[%c94] : memref<96xf32, #tpu.memory_space<smem>>
    %445 = vector.broadcast %444 : f32 to vector<16x14xf32>
    %446 = arith.mulf %18, %445 : vector<16x14xf32>
    %447 = arith.addf %443, %446 : vector<16x14xf32>
    %c95 = arith.constant 95 : index
    %448 = memref.load %arg2[%c95] : memref<96xf32, #tpu.memory_space<smem>>
    %449 = vector.broadcast %448 : f32 to vector<16x14xf32>
    %450 = arith.mulf %19, %449 : vector<16x14xf32>
    %451 = arith.addf %447, %450 : vector<16x14xf32>
    %c7_57 = arith.constant 7 : index
    %452 = memref.load %arg3[%c7_57] : memref<8xf32, #tpu.memory_space<smem>>
    %453 = vector.broadcast %452 : f32 to vector<16x14xf32>
    %454 = arith.addf %451, %453 : vector<16x14xf32>
    %cst_58 = arith.constant 0.000000e+00 : f32
    %455 = vector.broadcast %cst_58 : f32 to vector<16x14xf32>
    %456 = arith.maximumf %454, %455 : vector<16x14xf32>
    %c0_59 = arith.constant 0 : index
    %c7_60 = arith.constant 7 : index
    %c0_61 = arith.constant 0 : index
    %c0_62 = arith.constant 0 : index
    %457 = vector.load %arg5[%c0_59, %c7_60, %c0_61, %c0_62] : memref<1x8x16x14xf32, #tpu.memory_space<vmem>>, vector<1x1x16x14xf32>
    %458 = vector.shape_cast %457 : vector<1x1x16x14xf32> to vector<16x14xf32>
    %459 = vector.shape_cast %456 : vector<16x14xf32> to vector<1x1x16x14xf32>
    tpu.vector_store %arg5[%c0_59, %c7_60, %c0_61, %c0_62], %459 {strides = array<i32>} : memref<1x8x16x14xf32, #tpu.memory_space<vmem>>, vector<1x1x16x14xf32>,
    return
  }
  func.func @transform_0(%arg0: i32, %arg1: i32) -> i32 {
    %c0_i32 = arith.constant 0 : i32
    %c0_i32_0 = arith.constant 0 : i32
    return %c0_i32 : i32
  }
  func.func @transform_1(%arg0: i32, %arg1: i32) -> i32 {
    %c0_i32 = arith.constant 0 : i32
    %c0_i32_0 = arith.constant 0 : i32
    return %c0_i32 : i32
  }
  func.func @transform_2(%arg0: i32, %arg1: i32) -> (i32, i32, i32, i32) {
    %c0_i32 = arith.constant 0 : i32
    %c0_i32_0 = arith.constant 0 : i32
    %c0_i32_1 = arith.constant 0 : i32
    return %arg0, %c0_i32, %arg1, %c0_i32_0 : i32, i32, i32, i32
  }
  func.func @transform_3(%arg0: i32, %arg1: i32) -> (i32, i32, i32, i32) {
    %c0_i32 = arith.constant 0 : i32
    %c0_i32_0 = arith.constant 0 : i32
    %c0_i32_1 = arith.constant 0 : i32
    return %arg0, %c0_i32, %arg1, %c0_i32_0 : i32, i32, i32, i32
  }
}

</mosaic_0001>

<bundles_post_ra>
// kernel: tpu_custom_call.1
= control target key start
LH: loop header
LB: loop body
LE: loop exit
PB: predicated region body
PF: predicated region fallthrough
CT: control target
= control target key end

     0   :  { %8 = vsyncpa [#allocation4], 0  ;;  %s2741_s0 = inlined_call_operand.hbm [shape: f32[96], index: 0, kind: input, shape index: {}]   ;;  %s2742_s1 = inlined_call_operand.vmem [shape: f32[8], index: 1, kind: input, shape index: {}]   ;;  %s2743_s2 = inlined_call_operand.hbm [shape: f32[2,4,16,16], index: 2, kind: input, shape index: {}]   ;;  %s2744_s3 = inlined_call_operand.vmem [shape: f32[2,8,16,14], index: 3, kind: output, shape index: {}]  }
   0x1   :  { %9 = vsyncpa [#allocation5], 0 }
   0x2   :  { %10 = vsyncpa [#allocation3], 0 }
   0x3   :  { %12 = vsyncpa [#allocation3 + $0x1], 0  ;;  %s1892_s12 = smov 0   ;;  %s1894_s13 = smov 0  }
   0x4   :  { %s1896_s14 = smov 0   ;;  %s1898_s15 = smov 0  }
   0x5   :  { %s1900_s16 = smov 0   ;;  %s1902_s17 = smov 0  }
   0x6 LB: > { %s1518_s18 = sadd.s32 4294967295, %s1863_s17   ;;  %s81_s19 = sadd.s32 1, %s1851_s14  ;;  %s1863_s17 = sphi %s1902_s17, %s18_s17   ;;  %s1859_s16 = sphi %s1900_s16, %s2759_s16   ;;  %s1855_s15 = sphi %s1898_s15, %s2758_s15   ;;  %s1851_s14 = sphi %s1896_s14, %s2757_s14   ;;  %s1847_s13 = sphi %s1894_s13, %s2756_s13   ;;  %s1843_s12 = sphi %s1892_s12, %s2755_s12  }
   0x7   : > { %p88_p0 = scmp.ne.s32.totalorder %s1851_s14, %s1847_s13  ;;  %p89_p1 = scmp.eq.s32.totalorder %s1863_s17, 0 }
   0x8   : > { %p94_p2 = scmp.ne.s32.totalorder %s1847_s13, %s1843_s12  ;;  %p1926_p3 = scmp.eq.s32.totalorder %s1518_s18, 0 }
   0x9   : > { %p90_p4 = por %p89_p1, %p88_p0  ;;  %p1520_p5 = scmp.ge.s32.totalorder %s1863_s17, 1 }
   0xa   : > { %s2748_s20 = scalar_select %p1926_p3, 1, 0 }
   0xb   : > { %p1933_p6 = por %p1926_p3, %p94_p2  ;;  %p133_p7 = scmp.lt.s32.totalorder %s1863_s17, 3 }
   0xc   : > { %p1682_p9 = scmp.lt.s32.totalorder %s1863_s17, 2  ;;  %s155_s25 = sshll.u32 %s2742_s1, 4  ;;  %s156_s25 = int_to_ptr.vmem [resolvable:$true] %s155_s25 }
   0xd   : > { %s2749_s21 = scalar_select %p1933_p6, 1, 0 }
   0xe   : > { %p1938_p8 = pnand %p1520_p5, %p133_p7  ;;  %p1948_p11 = pnand %p1682_p9, %p90_p4 }
   0xf   : > { %s30_s28 = sadd.s32 1, %s1859_s16  ;;  %s1747_s4 = scalar_lea.hbm %s2741_s0, 16 }
  0x10   : > { %p1669_p10 = pneg %p1938_p8  ;;  %p1748_p13 = scmp.ne.s32.totalorder %s2741_s0, %s1747_s4 }
  0x11   : > { %p1754_p4 = scmp.lt.u32.totalorder %s1747_s4, %s2741_s0 }
  0x12   : > { %p1954_p12 = pnand %p1669_p10, %p1926_p3 }
  0x14   : > { %p1749_p0 = pneg %p1954_p12 }
  0x16   : > { %p1750_p1 = pnand %p1749_p0, %p1748_p13 }
  0x18   : > { %p1751_p2 = pneg %p1750_p1 }
  0x1a   : > { %p1756_p5 = pnand %p1754_p4, %p1751_p2 }
  0x1c   : > { %1759 = shalt.err (!%p1756_p5)
}
  0x1d   : > { %s1865_s9 = smov [#allocation2]   ;;  %s1760_s12 = scalar_lea.vmem %s156_s25, 16 }
  0x1e   : > { %1672 = dma.hbm_to_smem (!%p1954_p12), %s2741_s0, 16, %s1865_s9, [#allocation4]  }
  0x1f   : > { %p1761_p7 = scmp.ne.s32.totalorder %s156_s25, %s1760_s12  ;;  %p1768_p6 = scmp.lt.s32.totalorder %s156_s25, %s156_s25 }
  0x20   : > { %p1769_p13 = scmp.lt.s32.totalorder %s1760_s12, %s1760_s12 }
  0x21   : > { %p1763_p9 = pnand %p1761_p7, %p1749_p0 }
  0x22   : > { %p1770_p1 = por %p1769_p13, %p1768_p6 }
  0x23   : > { %p1764_p10 = pneg %p1763_p9 }
  0x25   : > { %p1771_p3 = pnand %p1770_p1, %p1764_p10 }
  0x27   : > { %1774 = shalt.err (!%p1771_p3)
}
  0x28   : > { %s1866_s18 = smov [#allocation6]   ;;  %p32_p2 = scmp.ge.s32.totalorder %s30_s28, 2 }
  0x29   : > { %1675 = dma.vmem_to_smem (!%p1954_p12), %s156_s25, 16, %s1866_s18, [#allocation5]  }
  0x2a   : > { %s166_s23 = sand.u32 1, %s1851_s14   ;;  %s2761_s28 = smov (%p32_p2, %s30_s28), 0 }
  0x2b   : > { %s1524_s24 = sshll.u32 %s166_s23, 6  ;;  %s1657_s29 = sshll.u32 %s1859_s16, 10 }
  0x2c   : > { %s76_s30 = ssub.s32 %s1859_s16, %s2761_s28  ;;  %s1986_s27 = scalar_lea.hbm %s2743_s2, %s1657_s29 }
  0x2d   : > { %p79_p3 = scmp.eq.s32.totalorder %s76_s30, 0  ;;  %s170_s25 = scalar_lea.vmem [#allocation7], %s1524_s24 }
  0x2e   : > { %s179_s6 = sshll.u32 %s170_s25, 4  ;;  %s1995_s8 = scalar_lea.sflag [#allocation3], %s166_s23  ;;  %s1988_s6 = int_to_ptr.vmem [resolvable:$true] %s179_s6 }
  0x2f   : > { %s1993_s7 = scalar_select %p79_p3, %s1851_s14, %s81_s19  }
  0x30   : > { %s1775_s9 = scalar_lea.hbm %s1986_s27, 1024  ;;  %p1777_p12 = pneg %p1948_p11 }
  0x31   : > { %p1776_p6 = scmp.ne.s32.totalorder %s1986_s27, %s1775_s9  ;;  %s1780_s12 = scalar_lea.hbm %s2743_s2, 2048 }
  0x32   : > { %p1781_p5 = scmp.lt.u32.totalorder %s1986_s27, %s2743_s2  ;;  %p1782_p7 = scmp.lt.u32.totalorder %s1780_s12, %s1775_s9 }
  0x33   : > { %p1778_p0 = pnand %p1777_p12, %p1776_p6  ;;  %p1784_p10 = scmp.lt.u32.totalorder %s1775_s9, %s1986_s27 }
  0x34   : > { %p1783_p9 = por %p1782_p7, %p1781_p5 }
  0x35   : > { %p1779_p4 = pneg %p1778_p0 }
  0x36   : > { %p1785_p13 = por %p1784_p10, %p1783_p9 }
  0x38   : > { %p1786_p1 = pnand %p1785_p13, %p1779_p4 }
  0x3a   : > { %1789 = shalt.err (!%p1786_p1)
}
  0x3b   : > { %s1790_s19 = scalar_lea.vmem %s1988_s6, 1024  ;;  %s1867_s23 = smov [#allocation7]  }
  0x3c   : > { %p1791_p2 = scmp.ne.s32.totalorder %s1988_s6, %s1790_s19  ;;  %s1795_s29 = sshll.u32 %s1867_s23, 4  ;;  %s1796_s29 = int_to_ptr.vmem [resolvable:$false] %s1795_s29 }
  0x3d   : > { %s1797_s30 = scalar_lea.vmem %s1796_s29, 2048  ;;  %p1798_p0 = scmp.lt.s32.totalorder %s1988_s6, %s1796_s29 }
  0x3e   : > { %p1793_p3 = pnand %p1791_p2, %p1777_p12  ;;  %p1799_p5 = scmp.lt.s32.totalorder %s1797_s30, %s1790_s19 }
  0x40   : > { %p1794_p6 = pneg %p1793_p3  ;;  %p1800_p7 = por %p1799_p5, %p1798_p0 }
  0x42   : > { %p1801_p9 = pnand %p1800_p7, %p1794_p6 }
  0x44   : > { %1804 = shalt.err (!%p1801_p9)
}
  0x45   : > { %s1868_s4 = smov 128   ;;  %s1869_s5 = smov 8  }
  0x46   : > { %1679 = dma.hbm_to_vmem [thread:$0]  (!%p1948_p11), %s1986_s27, 1024, %s1988_s6, %s1995_s8, %s1868_s4, %s1868_s4, %s1869_s5  }
  0x47   : > { %191 = sbr.rel (%p1938_p8) target bundleno = 470 (0x1d6), region = 32  ;;  %p2753_p12 = scmp.ne.s32.totalorder (!%p1938_p8), %s2748_s20, 0 }
  0x4e   : > { %1830 = dma.done.wait (%p2753_p12), [#allocation4], 16  }
  0x4f   : > { %1832 = vsyncadd (%p2753_p12), [#allocation4], 4294967280 }
  0x50   : > { %1834 = dma.done.wait (%p2753_p12), [#allocation5], 16  }
  0x51   : > { %1836 = vsyncadd (%p2753_p12), [#allocation5], 4294967280  ;;  %s201_s25 = sand.u32 1, %s1847_s13   ;;  %p2754_p8 = scmp.ne.s32.totalorder %s2749_s21, 0 }
  0x52   : > { %s1530_s26 = sshll.u32 %s201_s25, 6  ;;  %s202_s27 = scalar_lea.sflag [#allocation3], %s201_s25 }
  0x53   : > { %s2034_s6 = scalar_lea.vmem [#allocation7], %s1530_s26 }
  0x54   : > { %1838 = dma.done.wait (%p2754_p8), %s202_s27, 1024  }
  0x55   : > { %1840 = vsyncadd (%p2754_p8), %s202_s27, 4294966272 }
  0x56   : > { %210 = sfence }
  0x57   : > { %s1540_s22 = sld [smem:[#allocation2 + $0x2]]  ;;  %s1539_s8 = sld [smem:[#allocation2 + $0x1]]  ;;  %v2041_v0 = vld [vmem:[%s2034_s6] sm:$0xff]  ;;  %v2044_v1 = vld [vmem:[%s2034_s6 + $0x8] sm:$0xff]  ;;  %v2053_v8 = vld [vmem:[%s2034_s6 + $0x18] sm:$0xff]  ;;  %vm395_vm0 = vcmask 113664  }
  0x58   : > { %s1542_s20 = sld [smem:[#allocation2 + $0x4]]  ;;  %s1543_s9 = sld [smem:[#allocation2 + $0x5]]  ;;  %v2056_v10 = vld [vmem:[%s2034_s6 + $0x10] sm:$0xff]  ;;  %v2067_v16 = vld [vmem:[%s2034_s6 + $0x28] sm:$0xff]  ;;  %v2070_v18 = vld [vmem:[%s2034_s6 + $0x20] sm:$0xff] }
  0x59   : > { %s1870_s21 = smov 126   ;;  %s1871_s10 = smov 127   ;;  %v2081_v24 = vld [vmem:[%s2034_s6 + $0x38] sm:$0xff]  ;;  %v2084_v26 = vld [vmem:[%s2034_s6 + $0x30] sm:$0xff] }
  0x5a   : > { %s1545_s11 = sld [smem:[#allocation2 + $0x7]]  ;;  %s1546_s12 = sld [smem:[#allocation2 + $0x8]] }
  0x5b   : > { %s1548_s18 = sld [smem:[#allocation2 + $0xa]]  ;;  %s1549_s24 = sld [smem:[#allocation2 + $0xb]] }
  0x5c   : > { %s1551_s19 = sld [smem:[#allocation2 + $0xd]]  ;;  %s1552_s23 = sld [smem:[#allocation2 + $0xe]] }
  0x5d   : > { %v274_v2 = vstv %s1540_s22  ;;  %v260_v4 = vstv %s1539_s8  ;;  %s1554_s29 = sld [smem:[#allocation2 + $0x10]]  ;;  %s1555_s30 = sld [smem:[#allocation2 + $0x11]] }
  0x5e   : > { %v275_v3 = vmul.f32 %v274_v2, %v2041_v0  ;;  %v261_v5 = vmul.f32 %v260_v4, %v2041_v0  ;;  %v276_v6 = vmul.f32 %v274_v2, %v2044_v1  ;;  %v262_v7 = vmul.f32 %v260_v4, %v2044_v1  ;;  %s1557_s4 = sld [smem:[#allocation2 + $0x13]]  ;;  %s1558_s5 = sld [smem:[#allocation2 + $0x14]] }
  0x5f   : > { %v294_v9 = vstv %s1542_s20  ;;  %v308_v13 = vstv %s1543_s9  ;;  %s1560_s25 = sld [smem:[#allocation2 + $0x16]]  ;;  %s1561_s26 = sld [smem:[#allocation2 + $0x17]] }
  0x60   : > { %279 = vrot.lane.b32.xlu1 %v275_v3, %s1870_s21  ;;  %265 = vrot.lane.b32.xlu0 %v261_v5, %s1871_s10  ;;  %v296_v11 = vmul.f32 %v2053_v8, %v294_v9  ;;  %v295_v12 = vmul.f32 %v2056_v10, %v294_v9  ;;  %v310_v14 = vmul.f32 %v2053_v8, %v308_v13  ;;  %v328_v17 = vstv %s1545_s11  ;;  %s1566_s27 = sld [smem:[#allocation2 + $0x19]]  ;;  %s1567_s22 = sld [smem:[#allocation2 + $0x1a]] }
  0x61   : > { %v309_v15 = vmul.f32 %v2056_v10, %v308_v13  ;;  %v330_v19 = vmul.f32 %v2067_v16, %v328_v17  ;;  %v329_v20 = vmul.f32 %v2070_v18, %v328_v17  ;;  %v342_v21 = vstv %s1546_s12  ;;  %s1569_s8 = sld [smem:[#allocation2 + $0x1c]]  ;;  %s1570_s20 = sld [smem:[#allocation2 + $0x1d]] }
  0x62   : > { %v344_v22 = vmul.f32 %v2067_v16, %v342_v21  ;;  %v343_v23 = vmul.f32 %v2070_v18, %v342_v21  ;;  %v362_v25 = vstv %s1548_s18  ;;  %v376_v29 = vstv %s1549_s24  ;;  %s1572_s9 = sld [smem:[#allocation2 + $0x1f]]  ;;  %s1573_s11 = sld [smem:[#allocation2 + $0x20]] }
  0x63   : > { %v364_v27 = vmul.f32 %v2081_v24, %v362_v25  ;;  %v363_v28 = vmul.f32 %v2084_v26, %v362_v25  ;;  %v378_v30 = vmul.f32 %v2081_v24, %v376_v29  ;;  %v377_v31 = vmul.f32 %v2084_v26, %v376_v29  ;;  %s1575_s12 = sld [smem:[#allocation2 + $0x22]]  ;;  %s1576_s18 = sld [smem:[#allocation2 + $0x23]] }
  0x64   : > { %281 = vrot.lane.b32.xlu1 %v276_v6, %s1870_s21  ;;  %267 = vrot.lane.b32.xlu0 %v262_v7, %s1871_s10  ;;  %v403_v32 = vstv %s1551_s19  ;;  %v417_v35 = vstv %s1552_s23  ;;  %s1581_s24 = sld [smem:[#allocation2 + $0x25]]  ;;  %s1582_s19 = sld [smem:[#allocation2 + $0x26]] }
  0x65   : > { %v405_v33 = vmul.f32 %v403_v32, %v2044_v1  ;;  %v404_v34 = vmul.f32 %v403_v32, %v2041_v0  ;;  %v419_v36 = vmul.f32 %v417_v35, %v2044_v1  ;;  %v418_v37 = vmul.f32 %v417_v35, %v2041_v0  ;;  %s1584_s23 = sld [smem:[#allocation2 + $0x28]]  ;;  %p235_p11 = scmp.lt.s32.totalorder %s1855_s15, 1 }
  0x66   : > { %v437_v38 = vstv %s1554_s29  ;;  %v451_v41 = vstv %s1555_s30  ;;  %v471_v44 = vstv %s1557_s4  ;;  %v485_v47 = vstv %s1558_s5  ;;  %s1585_s29 = sld [smem:[#allocation2 + $0x29]]  ;;  %s1587_s30 = sld [smem:[#allocation2 + $0x2b]] }
  0x67   : > { %v439_v39 = vmul.f32 %v2053_v8, %v437_v38  ;;  %v438_v40 = vmul.f32 %v2056_v10, %v437_v38  ;;  %v453_v42 = vmul.f32 %v2053_v8, %v451_v41  ;;  %v452_v43 = vmul.f32 %v2056_v10, %v451_v41  ;;  %s255_s4 = sld [smem:[#allocation2]]  ;;  %s1588_s5 = sld [smem:[#allocation2 + $0x2c]] }
  0x68   : > { %301 = vrot.lane.b32.xlu1 %v296_v11, %s1871_s10  ;;  %299 = vrot.lane.b32.xlu0 %v295_v12, %s1871_s10  ;;  %v473_v45 = vmul.f32 %v2067_v16, %v471_v44  ;;  %v472_v46 = vmul.f32 %v2070_v18, %v471_v44  ;;  %v487_v48 = vmul.f32 %v2067_v16, %v485_v47  ;;  %v505_v50 = vstv %s1560_s25  ;;  %s1590_s25 = sld [smem:[#allocation2 + $0x2e]]  ;;  %s2763_s15 = smov (!%p235_p11, %s1855_s15), 1 }
  0x69   : > { %v486_v49 = vmul.f32 %v2070_v18, %v485_v47  ;;  %v507_v51 = vmul.f32 %v2081_v24, %v505_v50  ;;  %v506_v52 = vmul.f32 %v2084_v26, %v505_v50  ;;  %v519_v53 = vstv %s1561_s26  ;;  %s1541_s26 = sld [smem:[#allocation2 + $0x3]] }
  0x6a   : > { %v521_v54 = vmul.f32 %v2081_v24, %v519_v53  ;;  %v520_v55 = vmul.f32 %v2084_v26, %v519_v53  ;;  %v546_v56 = vstv %s1566_s27  ;;  %v560_v59 = vstv %s1567_s22  ;;  %s1591_s27 = sld [smem:[#allocation2 + $0x2f]]  ;;  %s2183_s22 = sld [smem:[#allocation2 + $0x31]] }
  0x6b   : > { %v548_v57 = vmul.f32 %v546_v56, %v2044_v1  ;;  %v547_v58 = vmul.f32 %v546_v56, %v2041_v0  ;;  %v562_v60 = vmul.f32 %v560_v59, %v2044_v1  ;;  %v561_v61 = vmul.f32 %v560_v59, %v2041_v0 }
  0x6c   : > { %315 = vrot.lane.b32.xlu1 %v310_v14, %s1870_s21  ;;  %313 = vrot.lane.b32.xlu0 %v309_v15, %s1870_s21  ;;  %v580_v62 = vstv %s1569_s8  ;;  %v594_v3 = vstv %s1570_s20  ;;  %s2185_s8 = sld [smem:[#allocation2 + $0x6]]  ;;  %s2192_s20 = sld [smem:[#allocation2 + $0x32]] }
  0x6d   : > { %v582_v63 = vmul.f32 %v2053_v8, %v580_v62  ;;  %v581_v2 = vmul.f32 %v2056_v10, %v580_v62  ;;  %v596_v4 = vmul.f32 %v2053_v8, %v594_v3  ;;  %v595_v5 = vmul.f32 %v2056_v10, %v594_v3 }
  0x6e   : > { %v614_v6 = vstv %s1572_s9  ;;  %v628_v11 = vstv %s1573_s11  ;;  %v648_v14 = vstv %s1575_s12  ;;  %v791_v44 = vstv %s1590_s25  ;;  %s2201_s9 = sld [smem:[#allocation2 + $0x34]]  ;;  %s2203_s11 = sld [smem:[#allocation2 + $0x9]] }
  0x6f   : > { %v616_v7 = vmul.f32 %v2067_v16, %v614_v6  ;;  %v615_v9 = vmul.f32 %v2070_v18, %v614_v6  ;;  %v630_v12 = vmul.f32 %v2067_v16, %v628_v11  ;;  %v629_v13 = vmul.f32 %v2070_v18, %v628_v11  ;;  %s2211_s12 = sld [smem:[#allocation2 + $0x35]] }
  0x70   : > { %335 = vrot.lane.b32.xlu1 %v330_v19, %s1871_s10  ;;  %333 = vrot.lane.b32.xlu0 %v329_v20, %s1871_s10  ;;  %v650_v15 = vmul.f32 %v2081_v24, %v648_v14  ;;  %v649_v17 = vmul.f32 %v2084_v26, %v648_v14  ;;  %v662_v19 = vstv %s1576_s18  ;;  %v792_v50 = vmul.f32 %v2084_v26, %v791_v44  ;;  %s2220_s18 = sld [smem:[#allocation2 + $0x37]]  ;;  %s2262_s25 = sld [smem:[#allocation2 + $0x3d]] }
  0x71   : > { %v664_v20 = vmul.f32 %v2081_v24, %v662_v19  ;;  %v663_v21 = vmul.f32 %v2084_v26, %v662_v19 }
  0x72   : > { %v322_v3 = vstv %s2185_s8  ;;  %s2281_s8 = sld [smem:[#allocation2 + $0x3e]] }
  0x73   : > { %v324_v14 = vmul.f32 %v2067_v16, %v322_v3 }
  0x74   : > { %349 = vrot.lane.b32.xlu1 %v344_v22, %s1870_s21  ;;  %347 = vrot.lane.b32.xlu0 %v343_v23, %s1870_s21  ;;  %v689_v22 = vstv %s1581_s24  ;;  %s2229_s24 = sld [smem:[#allocation2 + $0x38]] }
  0x75   : > { %v691_v23 = vmul.f32 %v689_v22, %v2044_v1  ;;  %v690_v25 = vmul.f32 %v689_v22, %v2041_v0 }
  0x78   : > { %369 = vrot.lane.b32.xlu1 %v364_v27, %s1871_s10  ;;  %367 = vrot.lane.b32.xlu0 %v363_v28, %s1871_s10  ;;  %v703_v27 = vstv %s1582_s19  ;;  %s2232_s19 = sld [smem:[#allocation6]] }
  0x79   : > { %v705_v28 = vmul.f32 %v703_v27, %v2044_v1  ;;  %v704_v29 = vmul.f32 %v703_v27, %v2041_v0 }
  0x7c   : > { %383 = vrot.lane.b32.xlu1 %v378_v30, %s1870_s21  ;;  %381 = vrot.lane.b32.xlu0 %v377_v31, %s1870_s21  ;;  %v723_v30 = vstv %s1584_s23  ;;  %s2234_s23 = sld [smem:[#allocation2 + $0xc]] }
  0x7d   : > { %v725_v31 = vmul.f32 %v2053_v8, %v723_v30  ;;  %v724_v32 = vmul.f32 %v2056_v10, %v723_v30 }
  0x80   : > { %410 = vrot.lane.b32.xlu1 %v405_v33, %s1871_s10  ;;  %408 = vrot.lane.b32.xlu0 %v404_v34, %s1871_s10  ;;  %v737_v33 = vstv %s1585_s29  ;;  %s2242_s29 = sld [smem:[#allocation2 + $0x3a]] }
  0x81   : > { %v739_v34 = vmul.f32 %v2053_v8, %v737_v33  ;;  %v738_v35 = vmul.f32 %v2056_v10, %v737_v33 }
  0x84   : > { %424 = vrot.lane.b32.xlu1 %v419_v36, %s1870_s21  ;;  %422 = vrot.lane.b32.xlu0 %v418_v37, %s1870_s21  ;;  %v757_v36 = vstv %s1587_s30  ;;  %s2244_s30 = sld [smem:[#allocation2 + $0xf]] }
  0x85   : > { %v759_v37 = vmul.f32 %v2067_v16, %v757_v36  ;;  %v758_v38 = vmul.f32 %v2070_v18, %v757_v36 }
  0x88   : > { %444 = vrot.lane.b32.xlu1 %v439_v39, %s1871_s10  ;;  %442 = vrot.lane.b32.xlu0 %v438_v40, %s1871_s10  ;;  %v256_v39 = vstv %s255_s4  ;;  %v771_v40 = vstv %s1588_s5  ;;  %s2252_s4 = sld [smem:[#allocation2 + $0x3b]]  ;;  %s1658_s5 = sshll.u32 %s2763_s15, 7 }
  0x89   : > { %v257_v41 = vmul.f32 %v256_v39, %v2041_v0  ;;  %s2374_s15 = sld [smem:[#allocation2 + $0x4d]] }
  0x8c   : > { %458 = vrot.lane.b32.xlu1 %v453_v42, %s1870_s21  ;;  %456 = vrot.lane.b32.xlu0 %v452_v43, %s1870_s21  ;;  %v773_v42 = vmul.f32 %v2067_v16, %v771_v40  ;;  %v772_v43 = vmul.f32 %v2070_v18, %v771_v40 }
  0x90   : > { %478 = vrot.lane.b32.xlu1 %v473_v45, %s1871_s10  ;;  %476 = vrot.lane.b32.xlu0 %v472_v46, %s1871_s10 }
  0x94   : > { %492 = vrot.lane.b32.xlu1 %v487_v48, %s1870_s21  ;;  %490 = vrot.lane.b32.xlu0 %v486_v49, %s1870_s21  ;;  %v258_v48 = vmul.f32 %v256_v39, %v2044_v1  ;;  %v793_v49 = vmul.f32 %v2081_v24, %v791_v44 }
  0x98   : > { %512 = vrot.lane.b32.xlu1 %v507_v51, %s1871_s10  ;;  %510 = vrot.lane.b32.xlu0 %v506_v52, %s1871_s10  ;;  %v288_v51 = vstv %s1541_s26  ;;  %v805_v52 = vstv %s1591_s27  ;;  %s2267_s27 = scalar_lea.vmem %s2744_s3, %s1658_s5  ;;  %s2354_s5 = sld [smem:[#allocation2 + $0x1e]] }
  0x99   : > { %v807_v59 = vmul.f32 %v2081_v24, %v805_v52  ;;  %s2377_s26 = sld [smem:[#allocation2 + $0x21]] }
  0x9c   : > { %526 = vrot.lane.b32.xlu1 %v521_v54, %s1870_s21  ;;  %524 = vrot.lane.b32.xlu0 %v520_v55, %s1870_s21  ;;  %v290_v55 = vmul.f32 %v2053_v8, %v288_v51 }
  0xa0   : > { %553 = vrot.lane.b32.xlu1 %v548_v57, %s1871_s10  ;;  %551 = vrot.lane.b32.xlu0 %v547_v58, %s1871_s10  ;;  %v289_v58 = vmul.f32 %v2056_v10, %v288_v51 }
  0xa4   : > { %567 = vrot.lane.b32.xlu1 %v562_v60, %s1870_s21  ;;  %565 = vrot.lane.b32.xlu0 %v561_v61, %s1870_s21  ;;  %v806_v60 = vmul.f32 %v2084_v26, %v805_v52  ;;  %v832_v61 = vstv %s2183_s22  ;;  %v914_v52 = vstv %s2229_s24  ;;  %s2271_s22 = sld [smem:[#allocation2 + $0x12]]  ;;  %s2322_s24 = sld [smem:[#allocation6 + $0x1]] }
  0xa5   : > { %v834_v6 = vmul.f32 %v832_v61, %v2044_v1 }
  0xa8   : > { %587 = vrot.lane.b32.xlu1 %v582_v63, %s1871_s10  ;;  %585 = vrot.lane.b32.xlu0 %v581_v2, %s1871_s10 }
  0xac   : > { %601 = vrot.lane.b32.xlu1 %v596_v4, %s1870_s21  ;;  %599 = vrot.lane.b32.xlu0 %v595_v5, %s1870_s21 }
  0xb0   : > { %621 = vrot.lane.b32.xlu1 %v616_v7, %s1871_s10  ;;  %619 = vrot.lane.b32.xlu0 %v615_v9, %s1871_s10  ;;  %v833_v7 = vmul.f32 %v832_v61, %v2041_v0  ;;  %v846_v9 = vstv %s2192_s20  ;;  %s2291_s20 = sld [smem:[#allocation2 + $0x40]] }
  0xb1   : > { %v847_v22 = vmul.f32 %v846_v9, %v2041_v0 }
  0xb4   : > { %635 = vrot.lane.b32.xlu1 %v630_v12, %s1870_s21  ;;  %633 = vrot.lane.b32.xlu0 %v629_v13, %s1870_s21 }
  0xb8   : > { %655 = vrot.lane.b32.xlu1 %v650_v15, %s1871_s10  ;;  %653 = vrot.lane.b32.xlu0 %v649_v17, %s1871_s10  ;;  %v323_v15 = vmul.f32 %v2070_v18, %v322_v3 }
  0xbc   : > { %669 = vrot.lane.b32.xlu1 %v664_v20, %s1870_s21  ;;  %667 = vrot.lane.b32.xlu0 %v663_v21, %s1870_s21  ;;  %v848_v21 = vmul.f32 %v846_v9, %v2044_v1 }
  0xc0   : > { %696 = vrot.lane.b32.xlu1 %v691_v23, %s1871_s10  ;;  %694 = vrot.lane.b32.xlu0 %v690_v25, %s1871_s10  ;;  %v866_v23 = vstv %s2201_s9  ;;  %s2294_s9 = sld [smem:[#allocation2 + $0x15]] }
  0xc1   : > { %v867_v33 = vmul.f32 %v2056_v10, %v866_v23 }
  0xc4   : > { %710 = vrot.lane.b32.xlu1 %v705_v28, %s1870_s21  ;;  %708 = vrot.lane.b32.xlu0 %v704_v29, %s1870_s21  ;;  %v356_v29 = vstv %s2203_s11  ;;  %s2302_s11 = sld [smem:[#allocation2 + $0x49]] }
  0xc8   : > { %730 = vrot.lane.b32.xlu1 %v725_v31, %s1871_s10  ;;  %728 = vrot.lane.b32.xlu0 %v724_v32, %s1871_s10  ;;  %v868_v31 = vmul.f32 %v2053_v8, %v866_v23 }
  0xcc   : > { %744 = vrot.lane.b32.xlu1 %v739_v34, %s1870_s21  ;;  %742 = vrot.lane.b32.xlu0 %v738_v35, %s1870_s21  ;;  %v358_v34 = vmul.f32 %v2081_v24, %v356_v29  ;;  %v880_v35 = vstv %s2211_s12  ;;  %s2310_s12 = sld [smem:[#allocation2 + $0x55]] }
  0xcd   : > { %v881_v44 = vmul.f32 %v2056_v10, %v880_v35 }
  0xd0   : > { %764 = vrot.lane.b32.xlu1 %v759_v37, %s1871_s10  ;;  %762 = vrot.lane.b32.xlu0 %v758_v38, %s1871_s10  ;;  %v357_v38 = vmul.f32 %v2084_v26, %v356_v29 }
  0xd2   : > { %v280_v45 = vpop.permute.xlu1 %279  ;;  %v266_v46 = vpop.permute.xlu0 %265 }
  0xd3   : > { %v271_v47 = vadd.f32 %v266_v46, %v257_v41 }
  0xd4   : > { %778 = vrot.lane.b32.xlu1 %v773_v42, %s1870_s21  ;;  %776 = vrot.lane.b32.xlu0 %v772_v43, %s1870_s21  ;;  %v882_v42 = vmul.f32 %v2053_v8, %v880_v35 }
  0xd5   : > { %v285_v56 = vadd.f32 %v280_v45, %v271_v47  ;;  %v900_v45 = vstv %s2220_s18  ;;  %s2319_s18 = sld [smem:[#allocation2 + $0x4a]] }
  0xd6   : > { %v282_v53 = vpop.permute.xlu1 %281  ;;  %v268_v54 = vpop.permute.xlu0 %267  ;;  %v901_v51 = vmul.f32 %v2070_v18, %v900_v45 }
  0xd7   : > { %v272_v57 = vadd.f32 %v268_v54, %v258_v48  ;;  %v291_v5 = vadd.f32 %v289_v58, %v285_v56  ;;  %v390_v54 = vstv %s2232_s19  ;;  %v399_v56 = vstv %s2234_s23  ;;  %s2324_s19 = sld [smem:[#allocation2 + $0x18]]  ;;  %s2331_s23 = sld [smem:[#allocation2 + $0x56]] }
  0xd8   : > { %798 = vrot.lane.b32.xlu1 %v793_v49, %s1871_s10  ;;  %796 = vrot.lane.b32.xlu0 %v792_v50, %s1871_s10  ;;  %v902_v49 = vmul.f32 %v2067_v16, %v900_v45 }
  0xd9   : > { %v286_v62 = vadd.f32 %v282_v53, %v272_v57 }
  0xda   : > { %v302_v63 = vpop.permute.xlu1 %301  ;;  %v300_v2 = vpop.permute.xlu0 %299 }
  0xdb   : > { %v292_v4 = vadd.f32 %v290_v55, %v286_v62  ;;  %v305_v12 = vadd.f32 %v300_v2, %v291_v5  ;;  %v401_v62 = vmul.f32 %v399_v56, %v2044_v1  ;;  %v934_v2 = vstv %s2242_s29  ;;  %s2333_s29 = sld [smem:[#allocation2 + $0x1b]] }
  0xdc   : > { %812 = vrot.lane.b32.xlu1 %v807_v59, %s1870_s21  ;;  %810 = vrot.lane.b32.xlu0 %v806_v60, %s1870_s21  ;;  %v916_v60 = vmul.f32 %v2067_v16, %v914_v52  ;;  %v400_v5 = vmul.f32 %v399_v56, %v2041_v0 }
  0xdd   : > { %v306_v11 = vadd.f32 %v302_v63, %v292_v4  ;;  %v915_v63 = vmul.f32 %v2070_v18, %v914_v52  ;;  %v499_v52 = vstv %s2294_s9  ;;  %s2405_s9 = sld [smem:[#allocation6 + $0x2]] }
  0xde   : > { %v316_v13 = vpop.permute.xlu1 %315  ;;  %v314_v17 = vpop.permute.xlu0 %313 }
  0xdf   : > { %v320_v19 = vadd.f32 %v316_v13, %v306_v11  ;;  %v319_v20 = vadd.f32 %v314_v17, %v305_v12  ;;  %v936_v12 = vmul.f32 %v2081_v24, %v934_v2  ;;  %v948_v17 = vstv %s2252_s4  ;;  %s2350_s4 = sld [smem:[#allocation2 + $0x58]] }
  0xe0   : > { %839 = vrot.lane.b32.xlu1 %v834_v6, %s1871_s10  ;;  %837 = vrot.lane.b32.xlu0 %v833_v7, %s1871_s10  ;;  %v431_v6 = vstv %s2244_s30  ;;  %v949_v29 = vmul.f32 %v2084_v26, %v948_v17  ;;  %s2340_s30 = sld [smem:[#allocation2 + $0x4c]] }
  0xe1   : > { %v326_v27 = vadd.f32 %v324_v14, %v320_v19  ;;  %v325_v28 = vadd.f32 %v323_v15, %v319_v20  ;;  %v935_v14 = vmul.f32 %v2084_v26, %v934_v2  ;;  %v433_v15 = vmul.f32 %v2053_v8, %v431_v6 }
  0xe2   : > { %v336_v25 = vpop.permute.xlu1 %335  ;;  %v334_v30 = vpop.permute.xlu0 %333 }
  0xe3   : > { %v340_v32 = vadd.f32 %v336_v25, %v326_v27  ;;  %v339_v36 = vadd.f32 %v334_v30, %v325_v28  ;;  %v950_v27 = vmul.f32 %v2081_v24, %v948_v17  ;;  %v975_v30 = vstv %s2262_s25  ;;  %s2364_s25 = sld [smem:[#allocation2 + $0x41]] }
  0xe4   : > { %853 = vrot.lane.b32.xlu1 %v848_v21, %s1870_s21  ;;  %851 = vrot.lane.b32.xlu0 %v847_v22, %s1870_s21  ;;  %v432_v21 = vmul.f32 %v2056_v10, %v431_v6  ;;  %v977_v35 = vmul.f32 %v975_v30, %v2044_v1  ;;  %v1261_v6 = vstv %s2310_s12  ;;  %s2414_s12 = sld [smem:[#allocation2 + $0x5b]] }
  0xe6   : > { %v350_v37 = vpop.permute.xlu1 %349  ;;  %v348_v40 = vpop.permute.xlu0 %347 }
  0xe7   : > { %v354_v39 = vadd.f32 %v350_v37, %v340_v32  ;;  %v353_v41 = vadd.f32 %v348_v40, %v339_v36  ;;  %v976_v37 = vmul.f32 %v975_v30, %v2041_v0 }
  0xe8   : > { %873 = vrot.lane.b32.xlu1 %v868_v31, %s1871_s10  ;;  %871 = vrot.lane.b32.xlu0 %v867_v33, %s1871_s10  ;;  %v465_v33 = vstv %s2271_s22  ;;  %s2385_s22 = sld [smem:[#allocation2 + $0x59]] }
  0xe9   : > { %v360_v43 = vadd.f32 %v358_v34, %v354_v39  ;;  %v359_v47 = vadd.f32 %v357_v38, %v353_v41  ;;  %v467_v38 = vmul.f32 %v2067_v16, %v465_v33  ;;  %v989_v39 = vstv %s2281_s8  ;;  %s2393_s8 = sld [smem:[#allocation2 + $0x43]] }
  0xea   : > { %v370_v46 = vpop.permute.xlu1 %369  ;;  %v368_v48 = vpop.permute.xlu0 %367 }
  0xeb   : > { %v374_v50 = vadd.f32 %v370_v46, %v360_v43  ;;  %v373_v53 = vadd.f32 %v368_v48, %v359_v47  ;;  %v991_v46 = vmul.f32 %v989_v39, %v2044_v1  ;;  %v990_v48 = vmul.f32 %v989_v39, %v2041_v0 }
  0xec   : > { %887 = vrot.lane.b32.xlu1 %v882_v42, %s1870_s21  ;;  %885 = vrot.lane.b32.xlu0 %v881_v44, %s1870_s21  ;;  %v466_v42 = vmul.f32 %v2070_v18, %v465_v33 }
  0xee   : > { %v384_v55 = vpop.permute.xlu1 %383  ;;  %v382_v58 = vpop.permute.xlu0 %381 }
  0xef   : > { %v388_v57 = vadd.f32 %v384_v55, %v374_v50  ;;  %v387_v59 = vadd.f32 %v382_v58, %v373_v53  ;;  %v1118_v58 = vstv %s2302_s11  ;;  %s2407_s11 = sld [smem:[#allocation2 + $0x24]] }
  0xf0   : > { %907 = vrot.lane.b32.xlu1 %v902_v49, %s1871_s10  ;;  %905 = vrot.lane.b32.xlu0 %v901_v51, %s1871_s10  ;;  %v1009_v49 = vstv %s2291_s20  ;;  %s2402_s20 = sld [smem:[#allocation2 + $0x4f]] }
  0xf1   : > { %v392_v61 = vadd.f32 %v390_v54, %v388_v57  ;;  %v391_v3 = vadd.f32 %v390_v54, %v387_v59  ;;  %v1011_v54 = vmul.f32 %v2053_v8, %v1009_v49  ;;  %v1010_v56 = vmul.f32 %v2056_v10, %v1009_v49 }
  0xf2   : > { %v411_v4 = vpop.permute.xlu1 %410  ;;  %v409_v9 = vpop.permute.xlu0 %408  ;;  %v501_v57 = vmul.f32 %v2081_v24, %v499_v52 }
  0xf3   : > { %v394_v7 = vmax.f32 %v392_v61, 0.0  ;;  %v393_v11 = vmax.f32 %v391_v3, 0.0  ;;  %v415_v13 = vadd.f32 %v411_v4, %v401_v62  ;;  %v414_v19 = vadd.f32 %v409_v9, %v400_v5 }
  0xf4   : > { %921 = vrot.lane.b32.xlu1 %v916_v60, %s1870_s21  ;;  %919 = vrot.lane.b32.xlu0 %v915_v63, %s1870_s21  ;;  %v500_v61 = vmul.f32 %v2084_v26, %v499_v52  ;;  %v1120_v3 = vmul.f32 %v1118_v58, %v2044_v1  ;;  %v1119_v5 = vmul.f32 %v1118_v58, %v2041_v0 }
  0xf5   : > { %397 = vst.msk [vmem:[%s2267_s27 + $0x8] sm:$0xff] %vm395_vm0, %v394_v7  ;;  %396 = vst.msk [vmem:[%s2267_s27] sm:$0xff] %vm395_vm0, %v393_v11 }
  0xf6   : > { %v425_v20 = vpop.permute.xlu1 %424  ;;  %v423_v23 = vpop.permute.xlu0 %422 }
  0xf7   : > { %v429_v22 = vadd.f32 %v425_v20, %v415_v13  ;;  %v428_v25 = vadd.f32 %v423_v23, %v414_v19  ;;  %v533_v19 = vstv %s2322_s24  ;;  %s2423_s24 = sld [smem:[#allocation2 + $0x44]] }
  0xf8   : > { %941 = vrot.lane.b32.xlu1 %v936_v12, %s1871_s10  ;;  %939 = vrot.lane.b32.xlu0 %v935_v14, %s1871_s10  ;;  %v1263_v12 = vmul.f32 %v1261_v6, %v2044_v1  ;;  %v1262_v14 = vmul.f32 %v1261_v6, %v2041_v0 }
  0xf9   : > { %v435_v28 = vadd.f32 %v433_v15, %v429_v22  ;;  %v434_v32 = vadd.f32 %v432_v21, %v428_v25  ;;  %v1132_v15 = vstv %s2319_s18  ;;  %v542_v21 = vstv %s2324_s19  ;;  %s2416_s18 = sld [smem:[#allocation2 + $0x27]]  ;;  %s2436_s19 = sld [smem:[#allocation2 + $0x50]] }
  0xfa   : > { %v445_v31 = vpop.permute.xlu1 %444  ;;  %v443_v34 = vpop.permute.xlu0 %442  ;;  %v1133_v30 = vmul.f32 %v1132_v15, %v2041_v0 }
  0xfb   : > { %v449_v36 = vadd.f32 %v445_v31, %v435_v28  ;;  %v448_v40 = vadd.f32 %v443_v34, %v434_v32  ;;  %v1275_v31 = vstv %s2331_s23  ;;  %v543_v34 = vmul.f32 %v542_v21, %v2041_v0  ;;  %s2443_s23 = sld [smem:[#allocation2 + $0x2a]] }
  0xfc   : > { %955 = vrot.lane.b32.xlu1 %v950_v27, %s1870_s21  ;;  %953 = vrot.lane.b32.xlu0 %v949_v29, %s1870_s21  ;;  %v1134_v27 = vmul.f32 %v1132_v15, %v2044_v1  ;;  %v544_v29 = vmul.f32 %v542_v21, %v2044_v1  ;;  %v1277_v39 = vmul.f32 %v1275_v31, %v2044_v1  ;;  %v1309_v21 = vstv %s2385_s22  ;;  %s2514_s22 = sld [smem:[#allocation2 + $0x30]] }
  0xfe   : > { %v459_v41 = vpop.permute.xlu1 %458  ;;  %v457_v44 = vpop.permute.xlu0 %456 }
  0xff   : > { %v463_v43 = vadd.f32 %v459_v41, %v449_v36  ;;  %v462_v45 = vadd.f32 %v457_v44, %v448_v40  ;;  %v1276_v41 = vmul.f32 %v1275_v31, %v2041_v0  ;;  %v1310_v31 = vmul.f32 %v2056_v10, %v1309_v21 }
 0x100   : > { %982 = vrot.lane.b32.xlu1 %v977_v35, %s1871_s10  ;;  %980 = vrot.lane.b32.xlu0 %v976_v37, %s1871_s10  ;;  %v574_v35 = vstv %s2333_s29  ;;  %s2456_s29 = sld [smem:[#allocation2 + $0x5c]] }
 0x101   : > { %v469_v47 = vadd.f32 %v467_v38, %v463_v43  ;;  %v468_v51 = vadd.f32 %v466_v42, %v462_v45  ;;  %v576_v42 = vmul.f32 %v2053_v8, %v574_v35  ;;  %v1152_v43 = vstv %s2340_s30  ;;  %s2475_s30 = sld [smem:[#allocation2 + $0x46]] }
 0x102   : > { %v479_v50 = vpop.permute.xlu1 %478  ;;  %v477_v53 = vpop.permute.xlu0 %476  ;;  %v575_v1 = vmul.f32 %v2056_v10, %v574_v35  ;;  %v1154_v0 = vmul.f32 %v2053_v8, %v1152_v43 }
 0x103   : > { %v483_v55 = vadd.f32 %v479_v50, %v469_v47  ;;  %v482_v59 = vadd.f32 %v477_v53, %v468_v51  ;;  %v1153_v50 = vmul.f32 %v2056_v10, %v1152_v43  ;;  %v1295_v51 = vstv %s2350_s4  ;;  %s2478_s4 = sld [smem:[#allocation2 + $0x2d]] }
 0x104   : > { %996 = vrot.lane.b32.xlu1 %v991_v46, %s1870_s21  ;;  %994 = vrot.lane.b32.xlu0 %v990_v48, %s1870_s21  ;;  %v1296_v58 = vmul.f32 %v2056_v10, %v1295_v51 }
 0x106   : > { %v493_v60 = vpop.permute.xlu1 %492  ;;  %v491_v63 = vpop.permute.xlu0 %490 }
 0x107   : > { %v497_v62 = vadd.f32 %v493_v60, %v483_v55  ;;  %v496_v2 = vadd.f32 %v491_v63, %v482_v59  ;;  %v1023_v60 = vstv %s2364_s25  ;;  %s2494_s25 = sld [smem:[#allocation2 + $0x5e]] }
 0x108   : > { %1016 = vrot.lane.b32.xlu1 %v1011_v54, %s1871_s10  ;;  %1014 = vrot.lane.b32.xlu0 %v1010_v56, %s1871_s10  ;;  %v608_v54 = vstv %s2354_s5  ;;  %v1297_v56 = vmul.f32 %v2053_v8, %v1295_v51  ;;  %s2486_s5 = sld [smem:[#allocation2 + $0x52]] }
 0x109   : > { %v503_v4 = vadd.f32 %v501_v57, %v497_v62  ;;  %v502_v9 = vadd.f32 %v500_v61, %v496_v2  ;;  %v610_v59 = vmul.f32 %v2067_v16, %v608_v54  ;;  %v609_v63 = vmul.f32 %v2070_v18, %v608_v54 }
 0x10a   : > { %v513_v7 = vpop.permute.xlu1 %512  ;;  %v511_v11 = vpop.permute.xlu0 %510 }
 0x10b   : > { %v517_v13 = vadd.f32 %v513_v7, %v503_v4  ;;  %v516_v17 = vadd.f32 %v511_v11, %v502_v9  ;;  %v1024_v7 = vmul.f32 %v2056_v10, %v1023_v60  ;;  %v1166_v9 = vstv %s2374_s15  ;;  %s2509_s15 = sld [smem:[#allocation2 + $0x47]] }
 0x10c   : > { %1125 = vrot.lane.b32.xlu1 %v1120_v3, %s1871_s10  ;;  %1123 = vrot.lane.b32.xlu0 %v1119_v5, %s1871_s10  ;;  %v1025_v5 = vmul.f32 %v2053_v8, %v1023_v60  ;;  %v1168_v15 = vmul.f32 %v2053_v8, %v1166_v9 }
 0x10e   : > { %v527_v20 = vpop.permute.xlu1 %526  ;;  %v525_v23 = vpop.permute.xlu0 %524 }
 0x10f   : > { %v531_v22 = vadd.f32 %v527_v20, %v517_v13  ;;  %v530_v25 = vadd.f32 %v525_v23, %v516_v17  ;;  %v642_v13 = vstv %s2377_s26  ;;  %s2512_s26 = sld [smem:[#allocation6 + $0x3]] }
 0x110   : > { %1268 = vrot.lane.b32.xlu1 %v1263_v12, %s1871_s10  ;;  %1266 = vrot.lane.b32.xlu0 %v1262_v14, %s1871_s10  ;;  %v644_v20 = vmul.f32 %v2081_v24, %v642_v13  ;;  %v1311_v24 = vmul.f32 %v2053_v8, %v1309_v21 }
 0x111   : > { %v535_v28 = vadd.f32 %v533_v19, %v531_v22  ;;  %v534_v32 = vadd.f32 %v533_v19, %v530_v25  ;;  %v1167_v19 = vmul.f32 %v2056_v10, %v1166_v9  ;;  %v643_v25 = vmul.f32 %v2084_v26, %v642_v13  ;;  %v2471_v9 = vld [vmem:[%s2034_s6 + $0x20] sm:$0xff] }
 0x112   : > { %v554_v33 = vpop.permute.xlu1 %553  ;;  %v552_v37 = vpop.permute.xlu0 %551  ;;  %v1186_v10 = vstv %s2402_s20  ;;  %s2530_s20 = sld [smem:[#allocation2 + $0x5f]] }
 0x113   : > { %v537_v36 = vmax.f32 %v535_v28, 0.0  ;;  %v536_v38 = vmax.f32 %v534_v32, 0.0  ;;  %v558_v40 = vadd.f32 %v554_v33, %v544_v29  ;;  %v557_v44 = vadd.f32 %v552_v37, %v543_v34 }
 0x114   : > { %1139 = vrot.lane.b32.xlu1 %v1134_v27, %s1870_s21  ;;  %1137 = vrot.lane.b32.xlu0 %v1133_v30, %s1870_s21  ;;  %v1043_v32 = vstv %s2393_s8  ;;  %s2523_s8 = sld [smem:[#allocation2 + $0x33]] }
 0x115   : > { %1564 = vst.msk [vmem:[%s2267_s27 + $0x18] sm:$0xff] %vm395_vm0, %v537_v36  ;;  %1563 = vst.msk [vmem:[%s2267_s27 + $0x10] sm:$0xff] %vm395_vm0, %v536_v38  ;;  %v1045_v35 = vmul.f32 %v2067_v16, %v1043_v32  ;;  %v1044_v36 = vmul.f32 %v2070_v18, %v1043_v32  ;;  %v676_v38 = vstv %s2405_s9  ;;  %s2542_s9 = sld [smem:[#allocation2 + $0x36]] }
 0x116   : > { %v568_v45 = vpop.permute.xlu1 %567  ;;  %v566_v47 = vpop.permute.xlu0 %565 }
 0x117   : > { %v572_v46 = vadd.f32 %v568_v45, %v558_v40  ;;  %v571_v48 = vadd.f32 %v566_v47, %v557_v44  ;;  %v685_v40 = vstv %s2407_s11  ;;  %v1188_v44 = vmul.f32 %v2067_v16, %v1186_v10  ;;  %s1610_s11 = sld [smem:[#allocation2 + $0x3c]] }
 0x118   : > { %1282 = vrot.lane.b32.xlu1 %v1277_v39, %s1870_s21  ;;  %1280 = vrot.lane.b32.xlu0 %v1276_v41, %s1870_s21  ;;  %v1187_v47 = vmul.f32 %v2070_v18, %v1186_v10  ;;  %v2499_v10 = vld [vmem:[%s2034_s6 + $0x38] sm:$0xff] }
 0x119   : > { %v578_v49 = vadd.f32 %v576_v42, %v572_v46  ;;  %v577_v53 = vadd.f32 %v575_v1, %v571_v48  ;;  %v2431_v1 = vld [vmem:[%s2034_s6 + $0x8] sm:$0xff]  ;;  %v1329_v48 = vstv %s2414_s12  ;;  %s1613_s12 = sld [smem:[#allocation2 + $0x3f]] }
 0x11a   : > { %v588_v52 = vpop.permute.xlu1 %587  ;;  %v586_v55 = vpop.permute.xlu0 %585  ;;  %v687_v46 = vmul.f32 %v2431_v1, %v685_v40 }
 0x11b   : > { %v592_v57 = vadd.f32 %v588_v52, %v578_v49  ;;  %v591_v61 = vadd.f32 %v586_v55, %v577_v53  ;;  %v717_v52 = vstv %s2416_s18  ;;  %s1625_s18 = sld [smem:[#allocation2 + $0x48]] }
 0x11c   : > { %1159 = vrot.lane.b32.xlu1 %v1154_v0, %s1871_s10  ;;  %1157 = vrot.lane.b32.xlu0 %v1153_v50, %s1871_s10  ;;  %v2439_v50 = vld [vmem:[%s2034_s6] sm:$0xff] }
 0x11d   : > { %v686_v51 = vmul.f32 %v2439_v50, %v685_v40 }
 0x11e   : > { %v602_v62 = vpop.permute.xlu1 %601  ;;  %v600_v3 = vpop.permute.xlu0 %599 }
 0x11f   : > { %v606_v2 = vadd.f32 %v602_v62, %v592_v57  ;;  %v605_v4 = vadd.f32 %v600_v3, %v591_v61  ;;  %v1057_v61 = vstv %s2423_s24  ;;  %s1640_s24 = sld [smem:[#allocation2 + $0x54]] }
 0x120   : > { %1302 = vrot.lane.b32.xlu1 %v1297_v56, %s1871_s10  ;;  %1300 = vrot.lane.b32.xlu0 %v1296_v58, %s1871_s10  ;;  %v1331_v56 = vmul.f32 %v2067_v16, %v1329_v48  ;;  %v1330_v58 = vmul.f32 %v2070_v18, %v1329_v48 }
 0x121   : > { %v612_v6 = vadd.f32 %v610_v59, %v606_v2  ;;  %v611_v12 = vadd.f32 %v609_v63, %v605_v4  ;;  %v2452_v59 = vld [vmem:[%s2034_s6 + $0x18] sm:$0xff]  ;;  %v2461_v63 = vld [vmem:[%s2034_s6 + $0x10] sm:$0xff] }
 0x122   : > { %v622_v11 = vpop.permute.xlu1 %621  ;;  %v620_v14 = vpop.permute.xlu0 %619  ;;  %v719_v60 = vmul.f32 %v2452_v59, %v717_v52  ;;  %v718_v2 = vmul.f32 %v2461_v63, %v717_v52  ;;  %v1363_v52 = vstv %s2494_s25  ;;  %s2661_s25 = sld [smem:[#allocation2 + $0x51]] }
 0x123   : > { %v626_v17 = vadd.f32 %v622_v11, %v612_v6  ;;  %v625_v22 = vadd.f32 %v620_v14, %v611_v12  ;;  %v1058_v11 = vmul.f32 %v2471_v9, %v1057_v61  ;;  %v1200_v12 = vstv %s2436_s19  ;;  %s2612_s19 = sld [smem:[#allocation2 + $0x4b]] }
 0x124   : > { %1030 = vrot.lane.b32.xlu1 %v1025_v5, %s1870_s21  ;;  %1028 = vrot.lane.b32.xlu0 %v1024_v7, %s1870_s21  ;;  %v2466_v5 = vld [vmem:[%s2034_s6 + $0x28] sm:$0xff]  ;;  %v1201_v21 = vmul.f32 %v2471_v9, %v1200_v12 }
 0x125   : > { %v1059_v6 = vmul.f32 %v2466_v5, %v1057_v61 }
 0x126   : > { %v636_v23 = vpop.permute.xlu1 %635  ;;  %v634_v28 = vpop.permute.xlu0 %633 }
 0x127   : > { %v640_v27 = vadd.f32 %v636_v23, %v626_v17  ;;  %v639_v29 = vadd.f32 %v634_v28, %v625_v22  ;;  %v1343_v23 = vstv %s2456_s29  ;;  %s2618_s29 = sld [smem:[#allocation2 + $0x42]] }
 0x128   : > { %1173 = vrot.lane.b32.xlu1 %v1168_v15, %s1870_s21  ;;  %1171 = vrot.lane.b32.xlu0 %v1167_v19, %s1870_s21  ;;  %v751_v15 = vstv %s2443_s23  ;;  %v1202_v19 = vmul.f32 %v2466_v5, %v1200_v12  ;;  %s2614_s23 = sld [smem:[#allocation2 + $0x57]] }
 0x129   : > { %v646_v30 = vadd.f32 %v644_v20, %v640_v27  ;;  %v645_v33 = vadd.f32 %v643_v25, %v639_v29  ;;  %v753_v22 = vmul.f32 %v2466_v5, %v751_v15  ;;  %v752_v28 = vmul.f32 %v2471_v9, %v751_v15 }
 0x12a   : > { %v656_v26 = vpop.permute.xlu1 %655  ;;  %v654_v34 = vpop.permute.xlu0 %653 }
 0x12b   : > { %v660_v8 = vadd.f32 %v656_v26, %v646_v30  ;;  %v659_v37 = vadd.f32 %v654_v34, %v645_v33  ;;  %v1344_v26 = vmul.f32 %v2471_v9, %v1343_v23  ;;  %v1077_v33 = vstv %s2475_s30  ;;  %s2628_s30 = sld [smem:[#allocation2 + $0x4e]] }
 0x12c   : > { %1316 = vrot.lane.b32.xlu1 %v1311_v24, %s1870_s21  ;;  %1314 = vrot.lane.b32.xlu0 %v1310_v31, %s1870_s21  ;;  %v1345_v31 = vmul.f32 %v2466_v5, %v1343_v23 }
 0x12e   : > { %v670_v39 = vpop.permute.xlu1 %669  ;;  %v668_v42 = vpop.permute.xlu0 %667 }
 0x12f   : > { %v674_v41 = vadd.f32 %v670_v39, %v660_v8  ;;  %v673_v43 = vadd.f32 %v668_v42, %v659_v37  ;;  %v785_v8 = vstv %s2478_s4  ;;  %v1079_v37 = vmul.f32 %v2499_v10, %v1077_v33  ;;  %v2504_v39 = vld [vmem:[%s2034_s6 + $0x30] sm:$0xff]  ;;  %s2521_s6 = sld [smem:[#allocation2 + $0x53]]  ;;  %s2636_s4 = sld [smem:[#allocation2 + $0x5a]] }
 0x130   : > { %1050 = vrot.lane.b32.xlu1 %v1045_v35, %s1871_s10  ;;  %1048 = vrot.lane.b32.xlu0 %v1044_v36, %s1871_s10  ;;  %v1078_v40 = vmul.f32 %v2504_v39, %v1077_v33  ;;  %v1220_v42 = vstv %s2486_s5  ;;  %s2644_s5 = sld [smem:[#allocation2 + $0x45]] }
 0x131   : > { %v678_v45 = vadd.f32 %v676_v38, %v674_v41  ;;  %v677_v0 = vadd.f32 %v676_v38, %v673_v43  ;;  %v787_v41 = vmul.f32 %v2499_v10, %v785_v8 }
 0x132   : > { %v697_v49 = vpop.permute.xlu1 %696  ;;  %v695_v54 = vpop.permute.xlu0 %694 }
 0x133   : > { %v680_v53 = vmax.f32 %v678_v45, 0.0  ;;  %v679_v55 = vmax.f32 %v677_v0, 0.0  ;;  %v701_v57 = vadd.f32 %v697_v49, %v687_v46  ;;  %v700_v16 = vadd.f32 %v695_v54, %v686_v51 }
 0x134   : > { %1193 = vrot.lane.b32.xlu1 %v1188_v44, %s1871_s10  ;;  %1191 = vrot.lane.b32.xlu0 %v1187_v47, %s1871_s10  ;;  %v786_v45 = vmul.f32 %v2504_v39, %v785_v8  ;;  %v1222_v0 = vmul.f32 %v2499_v10, %v1220_v42  ;;  %v1221_v51 = vmul.f32 %v2504_v39, %v1220_v42 }
 0x135   : > { %1579 = vst.msk [vmem:[%s2267_s27 + $0x28] sm:$0xff] %vm395_vm0, %v680_v53  ;;  %1578 = vst.msk [vmem:[%s2267_s27 + $0x20] sm:$0xff] %vm395_vm0, %v679_v55 }
 0x136   : > { %v711_v62 = vpop.permute.xlu1 %710  ;;  %v709_v18 = vpop.permute.xlu0 %708 }
 0x137   : > { %v715_v3 = vadd.f32 %v711_v62, %v701_v57  ;;  %v714_v4 = vadd.f32 %v709_v18, %v700_v16  ;;  %v819_v16 = vstv %s2512_s26  ;;  %s2683_s26 = sld [smem:[#allocation6 + $0x5]] }
 0x138   : > { %1336 = vrot.lane.b32.xlu1 %v1331_v56, %s1871_s10  ;;  %1334 = vrot.lane.b32.xlu0 %v1330_v58, %s1871_s10  ;;  %v1365_v56 = vmul.f32 %v2499_v10, %v1363_v52  ;;  %v1364_v58 = vmul.f32 %v2504_v39, %v1363_v52 }
 0x139   : > { %v721_v7 = vadd.f32 %v719_v60, %v715_v3  ;;  %v720_v14 = vadd.f32 %v718_v2, %v714_v4  ;;  %v1091_v60 = vstv %s2509_s15  ;;  %v828_v2 = vstv %s2514_s22  ;;  %s2674_s15 = sld [smem:[#allocation2 + $0x5d]]  ;;  %s2694_s22 = sld [smem:[#allocation6 + $0x6]] }
 0x13a   : > { %v731_v13 = vpop.permute.xlu1 %730  ;;  %v729_v17 = vpop.permute.xlu0 %728  ;;  %v1092_v12 = vmul.f32 %v2504_v39, %v1091_v60 }
 0x13b   : > { %v735_v20 = vadd.f32 %v731_v13, %v721_v7  ;;  %v734_v25 = vadd.f32 %v729_v17, %v720_v14  ;;  %v1234_v13 = vstv %s2521_s6  ;;  %v829_v17 = vmul.f32 %v2439_v50, %v828_v2  ;;  %s2703_s6 = sld [smem:[#allocation6 + $0x7]] }
 0x13c   : > { %1064 = vrot.lane.b32.xlu1 %v1059_v6, %s1870_s21  ;;  %1062 = vrot.lane.b32.xlu0 %v1058_v11, %s1870_s21  ;;  %v1093_v6 = vmul.f32 %v2499_v10, %v1091_v60  ;;  %v830_v11 = vmul.f32 %v2431_v1, %v828_v2  ;;  %v1236_v23 = vmul.f32 %v2499_v10, %v1234_v13 }
 0x13e   : > { %v745_v27 = vpop.permute.xlu1 %744  ;;  %v743_v24 = vpop.permute.xlu0 %742 }
 0x13f   : > { %v749_v29 = vadd.f32 %v745_v27, %v735_v20  ;;  %v748_v30 = vadd.f32 %v743_v24, %v734_v25  ;;  %v1235_v27 = vmul.f32 %v2504_v39, %v1234_v13 }
 0x140   : > { %1207 = vrot.lane.b32.xlu1 %v1202_v19, %s1870_s21  ;;  %1205 = vrot.lane.b32.xlu0 %v1201_v21, %s1870_s21  ;;  %v860_v19 = vstv %s2523_s8 }
 0x141   : > { %v755_v32 = vadd.f32 %v753_v22, %v749_v29  ;;  %v754_v35 = vadd.f32 %v752_v28, %v748_v30  ;;  %v862_v28 = vmul.f32 %v2452_v59, %v860_v19  ;;  %v1377_v29 = vstv %s2530_s20 }
 0x142   : > { %v765_v34 = vpop.permute.xlu1 %764  ;;  %v763_v36 = vpop.permute.xlu0 %762  ;;  %v1378_v8 = vmul.f32 %v2504_v39, %v1377_v29 }
 0x143   : > { %v769_v38 = vadd.f32 %v765_v34, %v755_v32  ;;  %v768_v43 = vadd.f32 %v763_v36, %v754_v35  ;;  %v1379_v34 = vmul.f32 %v2499_v10, %v1377_v29 }
 0x144   : > { %1350 = vrot.lane.b32.xlu1 %v1345_v31, %s1870_s21  ;;  %1348 = vrot.lane.b32.xlu0 %v1344_v26, %s1870_s21  ;;  %v861_v31 = vmul.f32 %v2461_v63, %v860_v19 }
 0x146   : > { %v779_v44 = vpop.permute.xlu1 %778  ;;  %v777_v47 = vpop.permute.xlu0 %776 }
 0x147   : > { %v783_v46 = vadd.f32 %v779_v44, %v769_v38  ;;  %v782_v48 = vadd.f32 %v777_v47, %v768_v43  ;;  %v894_v38 = vstv %s2542_s9 }
 0x148   : > { %1084 = vrot.lane.b32.xlu1 %v1079_v37, %s1871_s10  ;;  %1082 = vrot.lane.b32.xlu0 %v1078_v40, %s1871_s10  ;;  %v896_v42 = vmul.f32 %v2466_v5, %v894_v38 }
 0x149   : > { %v789_v49 = vadd.f32 %v787_v41, %v783_v46  ;;  %v788_v54 = vadd.f32 %v786_v45, %v782_v48  ;;  %v895_v45 = vmul.f32 %v2471_v9, %v894_v38 }
 0x14a   : > { %v799_v53 = vpop.permute.xlu1 %798  ;;  %v797_v55 = vpop.permute.xlu0 %796 }
 0x14b   : > { %v803_v57 = vadd.f32 %v799_v53, %v789_v49  ;;  %v802_v61 = vadd.f32 %v797_v55, %v788_v54 }
 0x14c   : > { %1227 = vrot.lane.b32.xlu1 %v1222_v0, %s1871_s10  ;;  %1225 = vrot.lane.b32.xlu0 %v1221_v51, %s1871_s10 }
 0x14e   : > { %v813_v62 = vpop.permute.xlu1 %812  ;;  %v811_v18 = vpop.permute.xlu0 %810 }
 0x14f   : > { %v817_v3 = vadd.f32 %v813_v62, %v803_v57  ;;  %v816_v4 = vadd.f32 %v811_v18, %v802_v61 }
 0x150   : > { %1370 = vrot.lane.b32.xlu1 %v1365_v56, %s1871_s10  ;;  %1368 = vrot.lane.b32.xlu0 %v1364_v58, %s1871_s10  ;;  %s1604_s10 = sld [smem:[#allocation2 + $0x39]] }
 0x151   : > { %v821_v7 = vadd.f32 %v819_v16, %v817_v3  ;;  %v820_v14 = vadd.f32 %v819_v16, %v816_v4 }
 0x152   : > { %v840_v15 = vpop.permute.xlu1 %839  ;;  %v838_v21 = vpop.permute.xlu0 %837 }
 0x153   : > { %v823_v20 = vmax.f32 %v821_v7, 0.0  ;;  %v822_v22 = vmax.f32 %v820_v14, 0.0  ;;  %v844_v25 = vadd.f32 %v840_v15, %v830_v11  ;;  %v843_v24 = vadd.f32 %v838_v21, %v829_v17 }
 0x154   : > { %1098 = vrot.lane.b32.xlu1 %v1093_v6, %s1870_s21  ;;  %1096 = vrot.lane.b32.xlu0 %v1092_v12, %s1870_s21 }
 0x155   : > { %1594 = vst.msk [vmem:[%s2267_s27 + $0x38] sm:$0xff] %vm395_vm0, %v823_v20  ;;  %1593 = vst.msk [vmem:[%s2267_s27 + $0x30] sm:$0xff] %vm395_vm0, %v822_v22 }
 0x156   : > { %v854_v30 = vpop.permute.xlu1 %853  ;;  %v852_v26 = vpop.permute.xlu0 %851  ;;  %v928_v52 = vstv %s1604_s10 }
 0x157   : > { %v858_v32 = vadd.f32 %v854_v30, %v844_v25  ;;  %v857_v33 = vadd.f32 %v852_v26, %v843_v24  ;;  %v930_v55 = vmul.f32 %v2499_v10, %v928_v52  ;;  %v929_v58 = vmul.f32 %v2504_v39, %v928_v52 }
 0x158   : > { %1241 = vrot.lane.b32.xlu1 %v1236_v23, %s1870_s21  ;;  %1239 = vrot.lane.b32.xlu0 %v1235_v27, %s1870_s21  ;;  %v1003_v52 = vstv %s1613_s12 }
 0x159   : > { %v864_v35 = vadd.f32 %v862_v28, %v858_v32  ;;  %v863_v37 = vadd.f32 %v861_v31, %v857_v33 }
 0x15a   : > { %v874_v36 = vpop.permute.xlu1 %873  ;;  %v872_v40 = vpop.permute.xlu0 %871 }
 0x15b   : > { %v878_v41 = vadd.f32 %v874_v36, %v864_v35  ;;  %v877_v43 = vadd.f32 %v872_v40, %v863_v37 }
 0x15c   : > { %1384 = vrot.lane.b32.xlu1 %v1379_v34, %s1870_s21  ;;  %1382 = vrot.lane.b32.xlu0 %v1378_v8, %s1870_s21  ;;  %s1607_s21 = sld [smem:[#allocation6 + $0x4]] }
 0x15e   : > { %v888_v44 = vpop.permute.xlu1 %887  ;;  %v886_v47 = vpop.permute.xlu0 %885 }
 0x15f   : > { %v892_v46 = vadd.f32 %v888_v44, %v878_v41  ;;  %v891_v48 = vadd.f32 %v886_v47, %v877_v43  ;;  %v971_v47 = vstv %s1610_s11 }
 0x161   : > { %v898_v0 = vadd.f32 %v896_v42, %v892_v46  ;;  %v897_v51 = vadd.f32 %v895_v45, %v891_v48 }
 0x162   : > { %v908_v49 = vpop.permute.xlu1 %907  ;;  %v906_v53 = vpop.permute.xlu0 %905  ;;  %v962_v7 = vstv %s1607_s21 }
 0x163   : > { %v912_v54 = vadd.f32 %v908_v49, %v898_v0  ;;  %v911_v56 = vadd.f32 %v906_v53, %v897_v51  ;;  %v973_v0 = vmul.f32 %v2431_v1, %v971_v47  ;;  %v972_v51 = vmul.f32 %v2439_v50, %v971_v47 }
 0x164   : > { %v1114_v53 = vstv %s1625_s18 }
 0x166   : > { %v922_v57 = vpop.permute.xlu1 %921  ;;  %v920_v61 = vpop.permute.xlu0 %919 }
 0x167   : > { %v926_v60 = vadd.f32 %v922_v57, %v912_v54  ;;  %v925_v16 = vadd.f32 %v920_v61, %v911_v56  ;;  %v1116_v61 = vmul.f32 %v2431_v1, %v1114_v53 }
 0x169   : > { %v932_v62 = vadd.f32 %v930_v55, %v926_v60  ;;  %v931_v3 = vadd.f32 %v929_v58, %v925_v16  ;;  %v1005_v60 = vmul.f32 %v2452_v59, %v1003_v52 }
 0x16a   : > { %v942_v2 = vpop.permute.xlu1 %941  ;;  %v940_v18 = vpop.permute.xlu0 %939 }
 0x16b   : > { %v946_v4 = vadd.f32 %v942_v2, %v932_v62  ;;  %v945_v6 = vadd.f32 %v940_v18, %v931_v3  ;;  %v1004_v62 = vmul.f32 %v2461_v63, %v1003_v52  ;;  %v1115_v2 = vmul.f32 %v2439_v50, %v1114_v53 }
 0x16c   : > { %v1257_v3 = vstv %s1640_s24 }
 0x16e   : > { %v956_v11 = vpop.permute.xlu1 %955  ;;  %v954_v13 = vpop.permute.xlu0 %953 }
 0x16f   : > { %v960_v12 = vadd.f32 %v956_v11, %v946_v4  ;;  %v959_v14 = vadd.f32 %v954_v13, %v945_v6  ;;  %v1146_v6 = vstv %s2612_s19 }
 0x171   : > { %v964_v15 = vadd.f32 %v962_v7, %v960_v12  ;;  %v963_v17 = vadd.f32 %v962_v7, %v959_v14  ;;  %v1259_v12 = vmul.f32 %v2431_v1, %v1257_v3  ;;  %v1147_v1 = vmul.f32 %v2461_v63, %v1146_v6 }
 0x172   : > { %v983_v19 = vpop.permute.xlu1 %982  ;;  %v981_v21 = vpop.permute.xlu0 %980 }
 0x173   : > { %v966_v20 = vmax.f32 %v964_v15, 0.0  ;;  %v965_v22 = vmax.f32 %v963_v17, 0.0  ;;  %v987_v55 = vadd.f32 %v983_v19, %v973_v0  ;;  %v986_v57 = vadd.f32 %v981_v21, %v972_v51 }
 0x174   : > { %v1258_v15 = vmul.f32 %v2439_v50, %v1257_v3  ;;  %v1289_v17 = vstv %s2614_s23  ;;  %v1148_v21 = vmul.f32 %v2452_v59, %v1146_v6 }
 0x175   : > { %1609 = vst.msk [vmem:[%s2267_s27 + $0x48] sm:$0xff] %vm395_vm0, %v966_v20  ;;  %1608 = vst.msk [vmem:[%s2267_s27 + $0x40] sm:$0xff] %vm395_vm0, %v965_v22  ;;  %v1037_v22 = vstv %s2618_s29  ;;  %v1290_v0 = vmul.f32 %v2461_v63, %v1289_v17 }
 0x176   : > { %v997_v23 = vpop.permute.xlu1 %996  ;;  %v995_v25 = vpop.permute.xlu0 %994  ;;  %v1039_v51 = vmul.f32 %v2466_v5, %v1037_v22 }
 0x177   : > { %v1001_v58 = vadd.f32 %v997_v23, %v987_v55  ;;  %v1000_v16 = vadd.f32 %v995_v25, %v986_v57 }
 0x179   : > { %v1007_v7 = vadd.f32 %v1005_v60, %v1001_v58  ;;  %v1006_v13 = vadd.f32 %v1004_v62, %v1000_v16 }
 0x17a   : > { %v2570_v27 = vpop.permute.xlu1 %1016  ;;  %v2572_v28 = vpop.permute.xlu0 %1014 }
 0x17b   : > { %v1020_v47 = vadd.f32 %v2572_v28, %v1006_v13 }
 0x17e   : > { %v1126_v29 = vpop.permute.xlu1 %1125  ;;  %v1124_v24 = vpop.permute.xlu0 %1123 }
 0x17f   : > { %v1130_v11 = vadd.f32 %v1126_v29, %v1116_v61  ;;  %v1129_v14 = vadd.f32 %v1124_v24, %v1115_v2  ;;  %v1021_v29 = vadd.f32 %v2570_v27, %v1007_v7  ;;  %v1291_v24 = vmul.f32 %v2452_v59, %v1289_v17 }
 0x180   : > { %v1071_v2 = vstv %s2644_s5 }
 0x182   : > { %v2574_v30 = vpop.permute.xlu1 %1268  ;;  %v2576_v31 = vpop.permute.xlu0 %1266 }
 0x183   : > { %v1273_v50 = vadd.f32 %v2574_v30, %v1259_v12  ;;  %v1180_v30 = vstv %s2628_s30 }
 0x184   : > { %v1182_v58 = vmul.f32 %v2466_v5, %v1180_v30  ;;  %v1181_v7 = vmul.f32 %v2471_v9, %v1180_v30 }
 0x186   : > { %v1140_v32 = vpop.permute.xlu1 %1139  ;;  %v1138_v26 = vpop.permute.xlu0 %1137 }
 0x187   : > { %v1144_v20 = vadd.f32 %v1140_v32, %v1130_v11  ;;  %v1143_v25 = vadd.f32 %v1138_v26, %v1129_v14  ;;  %v1272_v32 = vadd.f32 %v2576_v31, %v1258_v15  ;;  %v1038_v31 = vmul.f32 %v2471_v9, %v1037_v22 }
 0x189   : > { %v1150_v53 = vadd.f32 %v1148_v21, %v1144_v20  ;;  %v1149_v28 = vadd.f32 %v1147_v1, %v1143_v25  ;;  %v1214_v20 = vstv %s2661_s25 }
 0x18a   : > { %v2578_v33 = vpop.permute.xlu1 %1282  ;;  %v2580_v34 = vpop.permute.xlu0 %1280  ;;  %v1216_v25 = vmul.f32 %v2499_v10, %v1214_v20 }
 0x18b   : > { %v1287_v26 = vadd.f32 %v2578_v33, %v1273_v50  ;;  %v1286_v59 = vadd.f32 %v2580_v34, %v1272_v32 }
 0x18d   : > { %v1293_v61 = vadd.f32 %v1291_v24, %v1287_v26  ;;  %v1292_v34 = vadd.f32 %v1290_v0, %v1286_v59  ;;  %v1105_v26 = vstv %s2683_s26 }
 0x18e   : > { %v2582_v35 = vpop.permute.xlu1 %1159  ;;  %v2584_v8 = vpop.permute.xlu0 %1157 }
 0x18f   : > { %v1164_v57 = vadd.f32 %v2582_v35, %v1150_v53  ;;  %v1163_v33 = vadd.f32 %v2584_v8, %v1149_v28 }
 0x192   : > { %v2586_v36 = vpop.permute.xlu1 %1302  ;;  %v2588_v37 = vpop.permute.xlu0 %1300 }
 0x193   : > { %v1307_v35 = vadd.f32 %v2586_v36, %v1293_v61 }
 0x196   : > { %v2590_v38 = vpop.permute.xlu1 %1030  ;;  %v2592_v40 = vpop.permute.xlu0 %1028 }
 0x197   : > { %v1035_v27 = vadd.f32 %v2590_v38, %v1021_v29  ;;  %v1034_v63 = vadd.f32 %v2592_v40, %v1020_v47  ;;  %v1323_v38 = vstv %s2636_s4  ;;  %v1215_v29 = vmul.f32 %v2504_v39, %v1214_v20 }
 0x198   : > { %v1325_v11 = vmul.f32 %v2466_v5, %v1323_v38  ;;  %v1324_v13 = vmul.f32 %v2471_v9, %v1323_v38  ;;  %v1072_v9 = vmul.f32 %v2504_v39, %v1071_v2  ;;  %v1248_v38 = vstv %s2694_s22 }
 0x199   : > { %v1041_v62 = vadd.f32 %v1039_v51, %v1035_v27  ;;  %v1040_v40 = vadd.f32 %v1038_v31, %v1034_v63 }
 0x19a   : > { %v2594_v41 = vpop.permute.xlu1 %1173  ;;  %v2596_v42 = vpop.permute.xlu0 %1171 }
 0x19b   : > { %v1178_v16 = vadd.f32 %v2594_v41, %v1164_v57  ;;  %v1177_v6 = vadd.f32 %v2596_v42, %v1163_v33  ;;  %v1306_v41 = vadd.f32 %v2588_v37, %v1292_v34  ;;  %v1073_v42 = vmul.f32 %v2499_v10, %v1071_v2 }
 0x19d   : > { %v1184_v17 = vadd.f32 %v1182_v58, %v1178_v16  ;;  %v1183_v21 = vadd.f32 %v1181_v7, %v1177_v6 }
 0x19e   : > { %v2598_v43 = vpop.permute.xlu1 %1316  ;;  %v2600_v44 = vpop.permute.xlu0 %1314 }
 0x19f   : > { %v1321_v15 = vadd.f32 %v2598_v43, %v1307_v35  ;;  %v1320_v5 = vadd.f32 %v2600_v44, %v1306_v41 }
 0x1a2   : > { %v2602_v45 = vpop.permute.xlu1 %1050  ;;  %v2604_v46 = vpop.permute.xlu0 %1048 }
 0x1a3   : > { %v1055_v8 = vadd.f32 %v2602_v45, %v1041_v62  ;;  %v1054_v12 = vadd.f32 %v2604_v46, %v1040_v40  ;;  %v1391_v40 = vstv %s2703_s6 }
 0x1a6   : > { %v2606_v48 = vpop.permute.xlu1 %1193  ;;  %v2609_v49 = vpop.permute.xlu0 %1191 }
 0x1a7   : > { %v1198_v46 = vadd.f32 %v2606_v48, %v1184_v17  ;;  %v1197_v22 = vadd.f32 %v2609_v49, %v1183_v21  ;;  %v1357_v48 = vstv %s2674_s15 }
 0x1a8   : > { %v1359_v30 = vmul.f32 %v2499_v10, %v1357_v48 }
 0x1aa   : > { %v2616_v54 = vpop.permute.xlu1 %1336  ;;  %v2620_v56 = vpop.permute.xlu0 %1334 }
 0x1ae   : > { %v2626_v18 = vpop.permute.xlu1 %1064  ;;  %v2630_v4 = vpop.permute.xlu0 %1062 }
 0x1af   : > { %v1069_v36 = vadd.f32 %v2626_v18, %v1055_v8  ;;  %v1068_v37 = vadd.f32 %v2630_v4, %v1054_v12  ;;  %v1327_v18 = vadd.f32 %v1325_v11, %v1321_v15  ;;  %v1326_v4 = vadd.f32 %v1324_v13, %v1320_v5 }
 0x1b1   : > { %v1075_v44 = vadd.f32 %v1073_v42, %v1069_v36  ;;  %v1074_v47 = vadd.f32 %v1072_v9, %v1068_v37  ;;  %v1341_v49 = vadd.f32 %v2616_v54, %v1327_v18  ;;  %v1340_v0 = vadd.f32 %v2620_v56, %v1326_v4 }
 0x1b2   : > { %v2638_v19 = vpop.permute.xlu1 %1207  ;;  %v2642_v23 = vpop.permute.xlu0 %1205  ;;  %v1358_v54 = vmul.f32 %v2504_v39, %v1357_v48 }
 0x1b3   : > { %v1212_v1 = vadd.f32 %v2638_v19, %v1198_v46  ;;  %v1211_v24 = vadd.f32 %v2642_v23, %v1197_v22 }
 0x1b5   : > { %v1218_v27 = vadd.f32 %v1216_v25, %v1212_v1  ;;  %v1217_v63 = vadd.f32 %v1215_v29, %v1211_v24 }
 0x1b6   : > { %v2654_v52 = vpop.permute.xlu1 %1350  ;;  %v2659_v55 = vpop.permute.xlu0 %1348 }
 0x1b7   : > { %v1355_v19 = vadd.f32 %v2654_v52, %v1341_v49  ;;  %v1354_v28 = vadd.f32 %v2659_v55, %v1340_v0 }
 0x1b9   : > { %v1360_v62 = vadd.f32 %v1358_v54, %v1354_v28 }
 0x1ba   : > { %v1085_v60 = vpop.permute.xlu1 %1084  ;;  %v1083_v3 = vpop.permute.xlu0 %1082 }
 0x1bb   : > { %v1089_v32 = vadd.f32 %v1085_v60, %v1075_v44  ;;  %v1088_v51 = vadd.f32 %v1083_v3, %v1074_v47  ;;  %v1361_v60 = vadd.f32 %v1359_v30, %v1355_v19 }
 0x1be   : > { %v1228_v14 = vpop.permute.xlu1 %1227  ;;  %v1226_v45 = vpop.permute.xlu0 %1225 }
 0x1bf   : > { %v1232_v31 = vadd.f32 %v1228_v14, %v1218_v27  ;;  %v1231_v33 = vadd.f32 %v1226_v45, %v1217_v63 }
 0x1c2   : > { %v1371_v43 = vpop.permute.xlu1 %1370  ;;  %v1369_v50 = vpop.permute.xlu0 %1368 }
 0x1c3   : > { %v1375_v39 = vadd.f32 %v1371_v43, %v1361_v60  ;;  %v1374_v34 = vadd.f32 %v1369_v50, %v1360_v62 }
 0x1c6   : > { %v1099_v53 = vpop.permute.xlu1 %1098  ;;  %v1097_v23 = vpop.permute.xlu0 %1096 }
 0x1c7   : > { %v1103_v59 = vadd.f32 %v1099_v53, %v1089_v32  ;;  %v1102_v56 = vadd.f32 %v1097_v23, %v1088_v51 }
 0x1c9   : > { %v1107_v57 = vadd.f32 %v1105_v26, %v1103_v59  ;;  %v1106_v58 = vadd.f32 %v1105_v26, %v1102_v56 }
 0x1ca   : > { %v1242_v52 = vpop.permute.xlu1 %1241  ;;  %v1240_v16 = vpop.permute.xlu0 %1239 }
 0x1cb   : > { %v1109_v61 = vmax.f32 %v1107_v57, 0.0  ;;  %v1246_v10 = vadd.f32 %v1242_v52, %v1232_v31  ;;  %v1108_v55 = vmax.f32 %v1106_v58, 0.0  ;;  %v1245_v2 = vadd.f32 %v1240_v16, %v1231_v33 }
 0x1cd   : > { %1624 = vst.msk [vmem:[%s2267_s27 + $0x58] sm:$0xff] %vm395_vm0, %v1109_v61  ;;  %v1250_v3 = vadd.f32 %v1248_v38, %v1246_v10  ;;  %1623 = vst.msk [vmem:[%s2267_s27 + $0x50] sm:$0xff] %vm395_vm0, %v1108_v55  ;;  %v1249_v6 = vadd.f32 %v1248_v38, %v1245_v2 }
 0x1ce   : > { %v1385_v7 = vpop.permute.xlu1 %1384  ;;  %v1383_v11 = vpop.permute.xlu0 %1382 }
 0x1cf   : > { %v1252_v35 = vmax.f32 %v1250_v3, 0.0  ;;  %v1389_v8 = vadd.f32 %v1385_v7, %v1375_v39  ;;  %v1251_v41 = vmax.f32 %v1249_v6, 0.0  ;;  %v1388_v12 = vadd.f32 %v1383_v11, %v1374_v34 }
 0x1d1   : > { %1639 = vst.msk [vmem:[%s2267_s27 + $0x68] sm:$0xff] %vm395_vm0, %v1252_v35  ;;  %v1393_v13 = vadd.f32 %v1391_v40, %v1389_v8  ;;  %1638 = vst.msk [vmem:[%s2267_s27 + $0x60] sm:$0xff] %vm395_vm0, %v1251_v41  ;;  %v1392_v42 = vadd.f32 %v1391_v40, %v1388_v12 }
 0x1d3   : > { %v1395_v14 = vmax.f32 %v1393_v13, 0.0  ;;  %v1394_v15 = vmax.f32 %v1392_v42, 0.0 }
 0x1d5   : > { %1654 = vst.msk [vmem:[%s2267_s27 + $0x78] sm:$0xff] %vm395_vm0, %v1395_v14  ;;  %1653 = vst.msk [vmem:[%s2267_s27 + $0x70] sm:$0xff] %vm395_vm0, %v1394_v15 }
 0x1d6 PF: > { %s18_s17 = sadd.s32 1, %s1863_s17   ;;  %s2755_s12 = smov %s1847_s13 }
 0x1d7   : > { %p15_p4 = scmp.ge.s32.totalorder %s18_s17, 4   ;;  %s2756_s13 = smov %s1851_s14 }
 0x1d8   : > { %s2757_s14 = smov %s1993_s7  ;;  %s2758_s15 = smov %s1859_s16 }
 0x1d9   : > { %s2759_s16 = smov %s2761_s28  ;;  %17 = sbr.rel (!%p15_p4) target bundleno = 6 (0x6), region = 92 }
 0x1e0   :  { %1429 = vsyncpa [#allocation3], 1 }
 0x1e1   :  { %1431 = vsyncpa [#allocation3 + $0x1], 1 }
 0x1e2   :  { %1432 = vsyncpa [#allocation4], 1 }
 0x1e3   :  { %1434 = vsyncpa [#allocation4 + $0x1], 1 }
 0x1e4   :  { %1435 = vsyncpa [#allocation5], 1 }
 0x1e5   :  { %1437 = vsyncpa [#allocation5 + $0x1], 1 }

</bundles_post_ra>
